<compile_context>
chip_gen: v6e
topology: v6e:2x2x1
jax: 0.10.0
libtpu: 0.0.40
codegen_flags: <defaults>
</compile_context>

<pallas_src>
import functools
import math

import jax
import jax.numpy as jnp
from jax.experimental import pallas as pl
from jax.experimental.pallas import tpu as pltpu


def _spatial_attention_kernel(w_ref, x_ref, o_ref, *, kernel_size, slot, wt, hp):
    K = kernel_size
    P = K // 2
    NB, C, H, W = x_ref.shape
    f32 = jnp.float32

    # Single VMEM read of the (NB, C, H, W) block; channel reduce on the VPU.
    x = x_ref[...].astype(f32)
    avg = jnp.sum(x, axis=1) * (1.0 / C)          # torch.mean(x, dim=1)
    mx = jnp.max(x, axis=1)                       # torch.max(x, dim=1)[0]

    # Pack the NB images side by side along the lane axis.  Every image gets a
    # 2P-wide zero gutter on its right and the rows are zero-padded to hp, so
    # a cyclic roll (sublane or lane) reproduces the conv's zero padding for
    # all packed images simultaneously (wrap-around always lands in a gutter /
    # zero-row region).  Everything stays in registers: no padded scratch
    # buffer, no full-plane zero pass, no misaligned VMEM stores.
    gut = jnp.zeros((H, slot - W), f32)
    tail = wt - NB * slot

    def pack(imgs):                               # imgs: (NB, H, W) f32
        pieces = []
        for k in range(NB):
            pieces.append(imgs[k])
            pieces.append(gut)
        if tail:
            pieces.append(jnp.zeros((H, tail), f32))
        p = jnp.concatenate(pieces, axis=-1)      # (H, wt), lane-dense
        return jnp.concatenate([p, jnp.zeros((hp - H, wt), f32)], axis=0)

    planes = (pack(avg), pack(mx))                # the 2-channel "concat"

    # KxK conv, 2 -> 1 channels, as shifted multiply-accumulates:
    #   col[j][y, x] = sum_{c,i} w[c,i,j] * plane_c[y + i - P, x]
    #   out[y, x]    = sum_j col[j][y, x + j - P]
    # Row shifts: 2*K sublane rolls (XLU).  Column shifts: K lane rolls (XLU),
    # hoisted out of the tap loop.  The taps themselves are scalar-broadcast
    # mul-adds on the VPU over lane-dense registers.
    col = [jnp.zeros((H, wt), f32) for _ in range(K)]
    for c, plane in enumerate(planes):
        for i in range(K):
            s = (P - i) % hp
            r = pltpu.roll(plane, s, 0) if s else plane
            r = r[:H, :]                          # only the H output rows
            base = c * K * K + i * K
            for j in range(K):
                col[j] = col[j] + w_ref[base + j] * r
    acc = jnp.zeros((H, wt), f32)
    for j in range(K):
        s = (P - j) % wt
        acc = acc + (pltpu.roll(col[j], s, 1) if s else col[j])

    # Sigmoid: exp on the EUP, exact divide to match the f32 reference.
    res = 1.0 / (1.0 + jnp.exp(-acc))

    # Unpack the lane-packed result into the (NB, 1, H, W) output block.
    for k in range(NB):
        o_ref[k, 0] = res[:, k * slot:k * slot + W].astype(o_ref.dtype)


def spatial_attention_pallas(x, w, kernel_size=7):
    """x: (N, C, H, W), w: (1, 2, K, K) -> (N, 1, H, W) in x.dtype."""
    assert kernel_size in (3, 7)
    N, C, H, W = x.shape
    K = kernel_size
    P = K // 2

    slot = W + 2 * P                              # image width + zero gutter
    itemsize = jnp.dtype(x.dtype).itemsize
    # Pack as many images per grid step as stays within ~2 lane groups of
    # packed width and a modest per-block VMEM budget (largest divisor of N).
    max_pack = max(1, min(256 // slot, (4 << 20) // (C * H * W * itemsize)))
    nb = max(d for d in range(1, min(N, max_pack) + 1) if N % d == 0)
    wt = -(-nb * slot // 128) * 128               # lane-roll friendly width
    hp = -(-(H + 2 * P) // 8) * 8                 # sublane-roll friendly height

    w_flat = w.reshape(-1).astype(jnp.float32)    # (2*K*K,) scalars -> SMEM

    in_block = nb * C * H * W * itemsize
    out_block = nb * H * W * itemsize
    vmem_limit = int(min(100 << 20, max(32 << 20, 4 * (in_block + out_block))))

    kernel = functools.partial(_spatial_attention_kernel, kernel_size=K,
                               slot=slot, wt=wt, hp=hp)
    return pl.pallas_call(
        kernel,
        out_shape=jax.ShapeDtypeStruct((N, 1, H, W), x.dtype),
        grid_spec=pltpu.PrefetchScalarGridSpec(
            num_scalar_prefetch=0,
            grid=(N // nb,),
            in_specs=[
                # conv weights: tiny, in SMEM, consumed as scalar broadcasts
                pl.BlockSpec(memory_space=pltpu.MemorySpace.SMEM),
                # nb batch images per grid step
                pl.BlockSpec((nb, C, H, W), lambda n: (n, 0, 0, 0)),
            ],
            out_specs=pl.BlockSpec((nb, 1, H, W), lambda n: (n, 0, 0, 0)),
        ),
        compiler_params=pltpu.CompilerParams(
            dimension_semantics=("parallel",),
            vmem_limit_bytes=vmem_limit),
    )(w_flat, x)


def spatial_attention_ref(x, w, kernel_size=7):
    """Pure-JAX reference (matches the PyTorch module in eval mode)."""
    P = kernel_size // 2
    avg = jnp.mean(x, axis=1, keepdims=True)
    mx = jnp.max(x, axis=1, keepdims=True)
    cat = jnp.concatenate([avg, mx], axis=1)
    y = jax.lax.conv_general_dilated(
        cat, w, window_strides=(1, 1), padding=[(P, P), (P, P)],
        dimension_numbers=("NCHW", "OIHW", "NCHW"),
        precision=jax.lax.Precision.HIGHEST)
    return 1.0 / (1.0 + jnp.exp(-y))


if __name__ == "__main__":
    K = 7  # module default (padding = 3)
    key = jax.random.PRNGKey(0)
    kx, kw = jax.random.split(key)

    # Small shapes consistent with the module: NCHW input, 2->1 conv weight.
    x = jax.random.normal(kx, (2, 4, 16, 16), dtype=jnp.float32)
    bound = 1.0 / math.sqrt(2 * K * K)   # PyTorch default conv init range
    w = jax.random.uniform(kw, (1, 2, K, K), jnp.float32, -bound, bound)

    out = spatial_attention_pallas(x, w, kernel_size=K)
    out = jax.block_until_ready(out)

    assert out.shape == (2, 1, 16, 16), out.shape
    assert bool(jnp.all(jnp.isfinite(out)))

    ref = spatial_attention_ref(x, w, kernel_size=K)
    assert bool(jnp.allclose(out, ref, atol=2e-5, rtol=2e-5)), \
        float(jnp.max(jnp.abs(out - ref)))

    print("KERNEL_OK")
</pallas_src>

<mosaic_0001>
module attributes {stable_mosaic.version = 11 : i64} {
  func.func @_spatial_attention_kernel(%arg0: i32, %arg1: memref<98xf32, #tpu.memory_space<smem>>, %arg2: memref<2x4x16x16xf32, #tpu.memory_space<vmem>>, %arg3: memref<2x1x16x16xf32, #tpu.memory_space<vmem>>) attributes {dimension_semantics = [#tpu.dimension_semantics<parallel>], iteration_bounds = array<i64: 1>, scalar_prefetch = 0 : i64, scratch_operands = 0 : i64, tpu.core_type = #tpu.core_type<tc>, window_params = [{transform_indices = @transform_0, window_bounds = array<i64: 98>}, {transform_indices = @transform_1, window_bounds = array<i64: 2, 4, 16, 16>}, {transform_indices = @transform_2, window_bounds = array<i64: 2, 1, 16, 16>}]} {
    %c0 = arith.constant 0 : index
    %c0_0 = arith.constant 0 : index
    %c0_1 = arith.constant 0 : index
    %c0_2 = arith.constant 0 : index
    %0 = vector.load %arg2[%c0, %c0_0, %c0_1, %c0_2] : memref<2x4x16x16xf32, #tpu.memory_space<vmem>>, vector<2x4x16x16xf32>
    %cst = arith.constant dense<0.000000e+00> : vector<2x16x16xf32>
    %1 = vector.multi_reduction <add>, %0, %cst [1] : vector<2x4x16x16xf32> to vector<2x16x16xf32>
    %cst_3 = arith.constant 2.500000e-01 : f32
    %2 = vector.broadcast %cst_3 : f32 to vector<2x16x16xf32>
    %3 = arith.mulf %1, %2 : vector<2x16x16xf32>
    %cst_4 = arith.constant dense<0xFF800000> : vector<2x16x16xf32>
    %4 = vector.multi_reduction <maximumf>, %0, %cst_4 [1] : vector<2x4x16x16xf32> to vector<2x16x16xf32>
    %cst_5 = arith.constant 0.000000e+00 : f32
    %5 = vector.broadcast %cst_5 : f32 to vector<16x6xf32>
    %6 = vector.extract_strided_slice %3 {offsets = [0, 0, 0], sizes = [1, 16, 16], strides = [1, 1, 1]} : vector<2x16x16xf32> to vector<1x16x16xf32>
    %7 = vector.shape_cast %6 : vector<1x16x16xf32> to vector<16x16xf32>
    %8 = vector.extract_strided_slice %3 {offsets = [1, 0, 0], sizes = [1, 16, 16], strides = [1, 1, 1]} : vector<2x16x16xf32> to vector<1x16x16xf32>
    %9 = vector.shape_cast %8 : vector<1x16x16xf32> to vector<16x16xf32>
    %cst_6 = arith.constant 0.000000e+00 : f32
    %10 = vector.broadcast %cst_6 : f32 to vector<16x84xf32>
    %11 = tpu.concatenate %7, %5, %9, %5, %10 in 1 : vector<16x16xf32>, vector<16x6xf32>, vector<16x16xf32>, vector<16x6xf32>, vector<16x84xf32> -> vector<16x128xf32>
    %cst_7 = arith.constant 0.000000e+00 : f32
    %12 = vector.broadcast %cst_7 : f32 to vector<8x128xf32>
    %13 = tpu.concatenate %11, %12 in 0 : vector<16x128xf32>, vector<8x128xf32> -> vector<24x128xf32>
    %14 = vector.extract_strided_slice %4 {offsets = [0, 0, 0], sizes = [1, 16, 16], strides = [1, 1, 1]} : vector<2x16x16xf32> to vector<1x16x16xf32>
    %15 = vector.shape_cast %14 : vector<1x16x16xf32> to vector<16x16xf32>
    %16 = vector.extract_strided_slice %4 {offsets = [1, 0, 0], sizes = [1, 16, 16], strides = [1, 1, 1]} : vector<2x16x16xf32> to vector<1x16x16xf32>
    %17 = vector.shape_cast %16 : vector<1x16x16xf32> to vector<16x16xf32>
    %cst_8 = arith.constant 0.000000e+00 : f32
    %18 = vector.broadcast %cst_8 : f32 to vector<16x84xf32>
    %19 = tpu.concatenate %15, %5, %17, %5, %18 in 1 : vector<16x16xf32>, vector<16x6xf32>, vector<16x16xf32>, vector<16x6xf32>, vector<16x84xf32> -> vector<16x128xf32>
    %cst_9 = arith.constant 0.000000e+00 : f32
    %20 = vector.broadcast %cst_9 : f32 to vector<8x128xf32>
    %21 = tpu.concatenate %19, %20 in 0 : vector<16x128xf32>, vector<8x128xf32> -> vector<24x128xf32>
    %cst_10 = arith.constant 0.000000e+00 : f32
    %22 = vector.broadcast %cst_10 : f32 to vector<16x128xf32>
    %cst_11 = arith.constant 0.000000e+00 : f32
    %23 = vector.broadcast %cst_11 : f32 to vector<16x128xf32>
    %cst_12 = arith.constant 0.000000e+00 : f32
    %24 = vector.broadcast %cst_12 : f32 to vector<16x128xf32>
    %cst_13 = arith.constant 0.000000e+00 : f32
    %25 = vector.broadcast %cst_13 : f32 to vector<16x128xf32>
    %cst_14 = arith.constant 0.000000e+00 : f32
    %26 = vector.broadcast %cst_14 : f32 to vector<16x128xf32>
    %cst_15 = arith.constant 0.000000e+00 : f32
    %27 = vector.broadcast %cst_15 : f32 to vector<16x128xf32>
    %cst_16 = arith.constant 0.000000e+00 : f32
    %28 = vector.broadcast %cst_16 : f32 to vector<16x128xf32>
    %c3_i32 = arith.constant 3 : i32
    %29 = tpu.dynamic_rotate %13 by %c3_i32 dim 0 : vector<24x128xf32>, i32 -> vector<24x128xf32>
    %30 = vector.extract_strided_slice %29 {offsets = [0, 0], sizes = [16, 128], strides = [1, 1]} : vector<24x128xf32> to vector<16x128xf32>
    %c0_17 = arith.constant 0 : index
    %31 = memref.load %arg1[%c0_17] : memref<98xf32, #tpu.memory_space<smem>>
    %32 = vector.broadcast %31 : f32 to vector<16x128xf32>
    %33 = arith.mulf %32, %30 : vector<16x128xf32>
    %34 = arith.addf %22, %33 : vector<16x128xf32>
    %c1 = arith.constant 1 : index
    %35 = memref.load %arg1[%c1] : memref<98xf32, #tpu.memory_space<smem>>
    %36 = vector.broadcast %35 : f32 to vector<16x128xf32>
    %37 = arith.mulf %36, %30 : vector<16x128xf32>
    %38 = arith.addf %23, %37 : vector<16x128xf32>
    %c2 = arith.constant 2 : index
    %39 = memref.load %arg1[%c2] : memref<98xf32, #tpu.memory_space<smem>>
    %40 = vector.broadcast %39 : f32 to vector<16x128xf32>
    %41 = arith.mulf %40, %30 : vector<16x128xf32>
    %42 = arith.addf %24, %41 : vector<16x128xf32>
    %c3 = arith.constant 3 : index
    %43 = memref.load %arg1[%c3] : memref<98xf32, #tpu.memory_space<smem>>
    %44 = vector.broadcast %43 : f32 to vector<16x128xf32>
    %45 = arith.mulf %44, %30 : vector<16x128xf32>
    %46 = arith.addf %25, %45 : vector<16x128xf32>
    %c4 = arith.constant 4 : index
    %47 = memref.load %arg1[%c4] : memref<98xf32, #tpu.memory_space<smem>>
    %48 = vector.broadcast %47 : f32 to vector<16x128xf32>
    %49 = arith.mulf %48, %30 : vector<16x128xf32>
    %50 = arith.addf %26, %49 : vector<16x128xf32>
    %c5 = arith.constant 5 : index
    %51 = memref.load %arg1[%c5] : memref<98xf32, #tpu.memory_space<smem>>
    %52 = vector.broadcast %51 : f32 to vector<16x128xf32>
    %53 = arith.mulf %52, %30 : vector<16x128xf32>
    %54 = arith.addf %27, %53 : vector<16x128xf32>
    %c6 = arith.constant 6 : index
    %55 = memref.load %arg1[%c6] : memref<98xf32, #tpu.memory_space<smem>>
    %56 = vector.broadcast %55 : f32 to vector<16x128xf32>
    %57 = arith.mulf %56, %30 : vector<16x128xf32>
    %58 = arith.addf %28, %57 : vector<16x128xf32>
    %c2_i32 = arith.constant 2 : i32
    %59 = tpu.dynamic_rotate %13 by %c2_i32 dim 0 : vector<24x128xf32>, i32 -> vector<24x128xf32>
    %60 = vector.extract_strided_slice %59 {offsets = [0, 0], sizes = [16, 128], strides = [1, 1]} : vector<24x128xf32> to vector<16x128xf32>
    %c7 = arith.constant 7 : index
    %61 = memref.load %arg1[%c7] : memref<98xf32, #tpu.memory_space<smem>>
    %62 = vector.broadcast %61 : f32 to vector<16x128xf32>
    %63 = arith.mulf %62, %60 : vector<16x128xf32>
    %64 = arith.addf %34, %63 : vector<16x128xf32>
    %c8 = arith.constant 8 : index
    %65 = memref.load %arg1[%c8] : memref<98xf32, #tpu.memory_space<smem>>
    %66 = vector.broadcast %65 : f32 to vector<16x128xf32>
    %67 = arith.mulf %66, %60 : vector<16x128xf32>
    %68 = arith.addf %38, %67 : vector<16x128xf32>
    %c9 = arith.constant 9 : index
    %69 = memref.load %arg1[%c9] : memref<98xf32, #tpu.memory_space<smem>>
    %70 = vector.broadcast %69 : f32 to vector<16x128xf32>
    %71 = arith.mulf %70, %60 : vector<16x128xf32>
    %72 = arith.addf %42, %71 : vector<16x128xf32>
    %c10 = arith.constant 10 : index
    %73 = memref.load %arg1[%c10] : memref<98xf32, #tpu.memory_space<smem>>
    %74 = vector.broadcast %73 : f32 to vector<16x128xf32>
    %75 = arith.mulf %74, %60 : vector<16x128xf32>
    %76 = arith.addf %46, %75 : vector<16x128xf32>
    %c11 = arith.constant 11 : index
    %77 = memref.load %arg1[%c11] : memref<98xf32, #tpu.memory_space<smem>>
    %78 = vector.broadcast %77 : f32 to vector<16x128xf32>
    %79 = arith.mulf %78, %60 : vector<16x128xf32>
    %80 = arith.addf %50, %79 : vector<16x128xf32>
    %c12 = arith.constant 12 : index
    %81 = memref.load %arg1[%c12] : memref<98xf32, #tpu.memory_space<smem>>
    %82 = vector.broadcast %81 : f32 to vector<16x128xf32>
    %83 = arith.mulf %82, %60 : vector<16x128xf32>
    %84 = arith.addf %54, %83 : vector<16x128xf32>
    %c13 = arith.constant 13 : index
    %85 = memref.load %arg1[%c13] : memref<98xf32, #tpu.memory_space<smem>>
    %86 = vector.broadcast %85 : f32 to vector<16x128xf32>
    %87 = arith.mulf %86, %60 : vector<16x128xf32>
    %88 = arith.addf %58, %87 : vector<16x128xf32>
    %c1_i32 = arith.constant 1 : i32
    %89 = tpu.dynamic_rotate %13 by %c1_i32 dim 0 : vector<24x128xf32>, i32 -> vector<24x128xf32>
    %90 = vector.extract_strided_slice %89 {offsets = [0, 0], sizes = [16, 128], strides = [1, 1]} : vector<24x128xf32> to vector<16x128xf32>
    %c14 = arith.constant 14 : index
    %91 = memref.load %arg1[%c14] : memref<98xf32, #tpu.memory_space<smem>>
    %92 = vector.broadcast %91 : f32 to vector<16x128xf32>
    %93 = arith.mulf %92, %90 : vector<16x128xf32>
    %94 = arith.addf %64, %93 : vector<16x128xf32>
    %c15 = arith.constant 15 : index
    %95 = memref.load %arg1[%c15] : memref<98xf32, #tpu.memory_space<smem>>
    %96 = vector.broadcast %95 : f32 to vector<16x128xf32>
    %97 = arith.mulf %96, %90 : vector<16x128xf32>
    %98 = arith.addf %68, %97 : vector<16x128xf32>
    %c16 = arith.constant 16 : index
    %99 = memref.load %arg1[%c16] : memref<98xf32, #tpu.memory_space<smem>>
    %100 = vector.broadcast %99 : f32 to vector<16x128xf32>
    %101 = arith.mulf %100, %90 : vector<16x128xf32>
    %102 = arith.addf %72, %101 : vector<16x128xf32>
    %c17 = arith.constant 17 : index
    %103 = memref.load %arg1[%c17] : memref<98xf32, #tpu.memory_space<smem>>
    %104 = vector.broadcast %103 : f32 to vector<16x128xf32>
    %105 = arith.mulf %104, %90 : vector<16x128xf32>
    %106 = arith.addf %76, %105 : vector<16x128xf32>
    %c18 = arith.constant 18 : index
    %107 = memref.load %arg1[%c18] : memref<98xf32, #tpu.memory_space<smem>>
    %108 = vector.broadcast %107 : f32 to vector<16x128xf32>
    %109 = arith.mulf %108, %90 : vector<16x128xf32>
    %110 = arith.addf %80, %109 : vector<16x128xf32>
    %c19 = arith.constant 19 : index
    %111 = memref.load %arg1[%c19] : memref<98xf32, #tpu.memory_space<smem>>
    %112 = vector.broadcast %111 : f32 to vector<16x128xf32>
    %113 = arith.mulf %112, %90 : vector<16x128xf32>
    %114 = arith.addf %84, %113 : vector<16x128xf32>
    %c20 = arith.constant 20 : index
    %115 = memref.load %arg1[%c20] : memref<98xf32, #tpu.memory_space<smem>>
    %116 = vector.broadcast %115 : f32 to vector<16x128xf32>
    %117 = arith.mulf %116, %90 : vector<16x128xf32>
    %118 = arith.addf %88, %117 : vector<16x128xf32>
    %119 = vector.extract_strided_slice %13 {offsets = [0, 0], sizes = [16, 128], strides = [1, 1]} : vector<24x128xf32> to vector<16x128xf32>
    %c21 = arith.constant 21 : index
    %120 = memref.load %arg1[%c21] : memref<98xf32, #tpu.memory_space<smem>>
    %121 = vector.broadcast %120 : f32 to vector<16x128xf32>
    %122 = arith.mulf %121, %119 : vector<16x128xf32>
    %123 = arith.addf %94, %122 : vector<16x128xf32>
    %c22 = arith.constant 22 : index
    %124 = memref.load %arg1[%c22] : memref<98xf32, #tpu.memory_space<smem>>
    %125 = vector.broadcast %124 : f32 to vector<16x128xf32>
    %126 = arith.mulf %125, %119 : vector<16x128xf32>
    %127 = arith.addf %98, %126 : vector<16x128xf32>
    %c23 = arith.constant 23 : index
    %128 = memref.load %arg1[%c23] : memref<98xf32, #tpu.memory_space<smem>>
    %129 = vector.broadcast %128 : f32 to vector<16x128xf32>
    %130 = arith.mulf %129, %119 : vector<16x128xf32>
    %131 = arith.addf %102, %130 : vector<16x128xf32>
    %c24 = arith.constant 24 : index
    %132 = memref.load %arg1[%c24] : memref<98xf32, #tpu.memory_space<smem>>
    %133 = vector.broadcast %132 : f32 to vector<16x128xf32>
    %134 = arith.mulf %133, %119 : vector<16x128xf32>
    %135 = arith.addf %106, %134 : vector<16x128xf32>
    %c25 = arith.constant 25 : index
    %136 = memref.load %arg1[%c25] : memref<98xf32, #tpu.memory_space<smem>>
    %137 = vector.broadcast %136 : f32 to vector<16x128xf32>
    %138 = arith.mulf %137, %119 : vector<16x128xf32>
    %139 = arith.addf %110, %138 : vector<16x128xf32>
    %c26 = arith.constant 26 : index
    %140 = memref.load %arg1[%c26] : memref<98xf32, #tpu.memory_space<smem>>
    %141 = vector.broadcast %140 : f32 to vector<16x128xf32>
    %142 = arith.mulf %141, %119 : vector<16x128xf32>
    %143 = arith.addf %114, %142 : vector<16x128xf32>
    %c27 = arith.constant 27 : index
    %144 = memref.load %arg1[%c27] : memref<98xf32, #tpu.memory_space<smem>>
    %145 = vector.broadcast %144 : f32 to vector<16x128xf32>
    %146 = arith.mulf %145, %119 : vector<16x128xf32>
    %147 = arith.addf %118, %146 : vector<16x128xf32>
    %c23_i32 = arith.constant 23 : i32
    %148 = tpu.dynamic_rotate %13 by %c23_i32 dim 0 : vector<24x128xf32>, i32 -> vector<24x128xf32>
    %149 = vector.extract_strided_slice %148 {offsets = [0, 0], sizes = [16, 128], strides = [1, 1]} : vector<24x128xf32> to vector<16x128xf32>
    %c28 = arith.constant 28 : index
    %150 = memref.load %arg1[%c28] : memref<98xf32, #tpu.memory_space<smem>>
    %151 = vector.broadcast %150 : f32 to vector<16x128xf32>
    %152 = arith.mulf %151, %149 : vector<16x128xf32>
    %153 = arith.addf %123, %152 : vector<16x128xf32>
    %c29 = arith.constant 29 : index
    %154 = memref.load %arg1[%c29] : memref<98xf32, #tpu.memory_space<smem>>
    %155 = vector.broadcast %154 : f32 to vector<16x128xf32>
    %156 = arith.mulf %155, %149 : vector<16x128xf32>
    %157 = arith.addf %127, %156 : vector<16x128xf32>
    %c30 = arith.constant 30 : index
    %158 = memref.load %arg1[%c30] : memref<98xf32, #tpu.memory_space<smem>>
    %159 = vector.broadcast %158 : f32 to vector<16x128xf32>
    %160 = arith.mulf %159, %149 : vector<16x128xf32>
    %161 = arith.addf %131, %160 : vector<16x128xf32>
    %c31 = arith.constant 31 : index
    %162 = memref.load %arg1[%c31] : memref<98xf32, #tpu.memory_space<smem>>
    %163 = vector.broadcast %162 : f32 to vector<16x128xf32>
    %164 = arith.mulf %163, %149 : vector<16x128xf32>
    %165 = arith.addf %135, %164 : vector<16x128xf32>
    %c32 = arith.constant 32 : index
    %166 = memref.load %arg1[%c32] : memref<98xf32, #tpu.memory_space<smem>>
    %167 = vector.broadcast %166 : f32 to vector<16x128xf32>
    %168 = arith.mulf %167, %149 : vector<16x128xf32>
    %169 = arith.addf %139, %168 : vector<16x128xf32>
    %c33 = arith.constant 33 : index
    %170 = memref.load %arg1[%c33] : memref<98xf32, #tpu.memory_space<smem>>
    %171 = vector.broadcast %170 : f32 to vector<16x128xf32>
    %172 = arith.mulf %171, %149 : vector<16x128xf32>
    %173 = arith.addf %143, %172 : vector<16x128xf32>
    %c34 = arith.constant 34 : index
    %174 = memref.load %arg1[%c34] : memref<98xf32, #tpu.memory_space<smem>>
    %175 = vector.broadcast %174 : f32 to vector<16x128xf32>
    %176 = arith.mulf %175, %149 : vector<16x128xf32>
    %177 = arith.addf %147, %176 : vector<16x128xf32>
    %c22_i32 = arith.constant 22 : i32
    %178 = tpu.dynamic_rotate %13 by %c22_i32 dim 0 : vector<24x128xf32>, i32 -> vector<24x128xf32>
    %179 = vector.extract_strided_slice %178 {offsets = [0, 0], sizes = [16, 128], strides = [1, 1]} : vector<24x128xf32> to vector<16x128xf32>
    %c35 = arith.constant 35 : index
    %180 = memref.load %arg1[%c35] : memref<98xf32, #tpu.memory_space<smem>>
    %181 = vector.broadcast %180 : f32 to vector<16x128xf32>
    %182 = arith.mulf %181, %179 : vector<16x128xf32>
    %183 = arith.addf %153, %182 : vector<16x128xf32>
    %c36 = arith.constant 36 : index
    %184 = memref.load %arg1[%c36] : memref<98xf32, #tpu.memory_space<smem>>
    %185 = vector.broadcast %184 : f32 to vector<16x128xf32>
    %186 = arith.mulf %185, %179 : vector<16x128xf32>
    %187 = arith.addf %157, %186 : vector<16x128xf32>
    %c37 = arith.constant 37 : index
    %188 = memref.load %arg1[%c37] : memref<98xf32, #tpu.memory_space<smem>>
    %189 = vector.broadcast %188 : f32 to vector<16x128xf32>
    %190 = arith.mulf %189, %179 : vector<16x128xf32>
    %191 = arith.addf %161, %190 : vector<16x128xf32>
    %c38 = arith.constant 38 : index
    %192 = memref.load %arg1[%c38] : memref<98xf32, #tpu.memory_space<smem>>
    %193 = vector.broadcast %192 : f32 to vector<16x128xf32>
    %194 = arith.mulf %193, %179 : vector<16x128xf32>
    %195 = arith.addf %165, %194 : vector<16x128xf32>
    %c39 = arith.constant 39 : index
    %196 = memref.load %arg1[%c39] : memref<98xf32, #tpu.memory_space<smem>>
    %197 = vector.broadcast %196 : f32 to vector<16x128xf32>
    %198 = arith.mulf %197, %179 : vector<16x128xf32>
    %199 = arith.addf %169, %198 : vector<16x128xf32>
    %c40 = arith.constant 40 : index
    %200 = memref.load %arg1[%c40] : memref<98xf32, #tpu.memory_space<smem>>
    %201 = vector.broadcast %200 : f32 to vector<16x128xf32>
    %202 = arith.mulf %201, %179 : vector<16x128xf32>
    %203 = arith.addf %173, %202 : vector<16x128xf32>
    %c41 = arith.constant 41 : index
    %204 = memref.load %arg1[%c41] : memref<98xf32, #tpu.memory_space<smem>>
    %205 = vector.broadcast %204 : f32 to vector<16x128xf32>
    %206 = arith.mulf %205, %179 : vector<16x128xf32>
    %207 = arith.addf %177, %206 : vector<16x128xf32>
    %c21_i32 = arith.constant 21 : i32
    %208 = tpu.dynamic_rotate %13 by %c21_i32 dim 0 : vector<24x128xf32>, i32 -> vector<24x128xf32>
    %209 = vector.extract_strided_slice %208 {offsets = [0, 0], sizes = [16, 128], strides = [1, 1]} : vector<24x128xf32> to vector<16x128xf32>
    %c42 = arith.constant 42 : index
    %210 = memref.load %arg1[%c42] : memref<98xf32, #tpu.memory_space<smem>>
    %211 = vector.broadcast %210 : f32 to vector<16x128xf32>
    %212 = arith.mulf %211, %209 : vector<16x128xf32>
    %213 = arith.addf %183, %212 : vector<16x128xf32>
    %c43 = arith.constant 43 : index
    %214 = memref.load %arg1[%c43] : memref<98xf32, #tpu.memory_space<smem>>
    %215 = vector.broadcast %214 : f32 to vector<16x128xf32>
    %216 = arith.mulf %215, %209 : vector<16x128xf32>
    %217 = arith.addf %187, %216 : vector<16x128xf32>
    %c44 = arith.constant 44 : index
    %218 = memref.load %arg1[%c44] : memref<98xf32, #tpu.memory_space<smem>>
    %219 = vector.broadcast %218 : f32 to vector<16x128xf32>
    %220 = arith.mulf %219, %209 : vector<16x128xf32>
    %221 = arith.addf %191, %220 : vector<16x128xf32>
    %c45 = arith.constant 45 : index
    %222 = memref.load %arg1[%c45] : memref<98xf32, #tpu.memory_space<smem>>
    %223 = vector.broadcast %222 : f32 to vector<16x128xf32>
    %224 = arith.mulf %223, %209 : vector<16x128xf32>
    %225 = arith.addf %195, %224 : vector<16x128xf32>
    %c46 = arith.constant 46 : index
    %226 = memref.load %arg1[%c46] : memref<98xf32, #tpu.memory_space<smem>>
    %227 = vector.broadcast %226 : f32 to vector<16x128xf32>
    %228 = arith.mulf %227, %209 : vector<16x128xf32>
    %229 = arith.addf %199, %228 : vector<16x128xf32>
    %c47 = arith.constant 47 : index
    %230 = memref.load %arg1[%c47] : memref<98xf32, #tpu.memory_space<smem>>
    %231 = vector.broadcast %230 : f32 to vector<16x128xf32>
    %232 = arith.mulf %231, %209 : vector<16x128xf32>
    %233 = arith.addf %203, %232 : vector<16x128xf32>
    %c48 = arith.constant 48 : index
    %234 = memref.load %arg1[%c48] : memref<98xf32, #tpu.memory_space<smem>>
    %235 = vector.broadcast %234 : f32 to vector<16x128xf32>
    %236 = arith.mulf %235, %209 : vector<16x128xf32>
    %237 = arith.addf %207, %236 : vector<16x128xf32>
    %c3_i32_18 = arith.constant 3 : i32
    %238 = tpu.dynamic_rotate %21 by %c3_i32_18 dim 0 : vector<24x128xf32>, i32 -> vector<24x128xf32>
    %239 = vector.extract_strided_slice %238 {offsets = [0, 0], sizes = [16, 128], strides = [1, 1]} : vector<24x128xf32> to vector<16x128xf32>
    %c49 = arith.constant 49 : index
    %240 = memref.load %arg1[%c49] : memref<98xf32, #tpu.memory_space<smem>>
    %241 = vector.broadcast %240 : f32 to vector<16x128xf32>
    %242 = arith.mulf %241, %239 : vector<16x128xf32>
    %243 = arith.addf %213, %242 : vector<16x128xf32>
    %c50 = arith.constant 50 : index
    %244 = memref.load %arg1[%c50] : memref<98xf32, #tpu.memory_space<smem>>
    %245 = vector.broadcast %244 : f32 to vector<16x128xf32>
    %246 = arith.mulf %245, %239 : vector<16x128xf32>
    %247 = arith.addf %217, %246 : vector<16x128xf32>
    %c51 = arith.constant 51 : index
    %248 = memref.load %arg1[%c51] : memref<98xf32, #tpu.memory_space<smem>>
    %249 = vector.broadcast %248 : f32 to vector<16x128xf32>
    %250 = arith.mulf %249, %239 : vector<16x128xf32>
    %251 = arith.addf %221, %250 : vector<16x128xf32>
    %c52 = arith.constant 52 : index
    %252 = memref.load %arg1[%c52] : memref<98xf32, #tpu.memory_space<smem>>
    %253 = vector.broadcast %252 : f32 to vector<16x128xf32>
    %254 = arith.mulf %253, %239 : vector<16x128xf32>
    %255 = arith.addf %225, %254 : vector<16x128xf32>
    %c53 = arith.constant 53 : index
    %256 = memref.load %arg1[%c53] : memref<98xf32, #tpu.memory_space<smem>>
    %257 = vector.broadcast %256 : f32 to vector<16x128xf32>
    %258 = arith.mulf %257, %239 : vector<16x128xf32>
    %259 = arith.addf %229, %258 : vector<16x128xf32>
    %c54 = arith.constant 54 : index
    %260 = memref.load %arg1[%c54] : memref<98xf32, #tpu.memory_space<smem>>
    %261 = vector.broadcast %260 : f32 to vector<16x128xf32>
    %262 = arith.mulf %261, %239 : vector<16x128xf32>
    %263 = arith.addf %233, %262 : vector<16x128xf32>
    %c55 = arith.constant 55 : index
    %264 = memref.load %arg1[%c55] : memref<98xf32, #tpu.memory_space<smem>>
    %265 = vector.broadcast %264 : f32 to vector<16x128xf32>
    %266 = arith.mulf %265, %239 : vector<16x128xf32>
    %267 = arith.addf %237, %266 : vector<16x128xf32>
    %c2_i32_19 = arith.constant 2 : i32
    %268 = tpu.dynamic_rotate %21 by %c2_i32_19 dim 0 : vector<24x128xf32>, i32 -> vector<24x128xf32>
    %269 = vector.extract_strided_slice %268 {offsets = [0, 0], sizes = [16, 128], strides = [1, 1]} : vector<24x128xf32> to vector<16x128xf32>
    %c56 = arith.constant 56 : index
    %270 = memref.load %arg1[%c56] : memref<98xf32, #tpu.memory_space<smem>>
    %271 = vector.broadcast %270 : f32 to vector<16x128xf32>
    %272 = arith.mulf %271, %269 : vector<16x128xf32>
    %273 = arith.addf %243, %272 : vector<16x128xf32>
    %c57 = arith.constant 57 : index
    %274 = memref.load %arg1[%c57] : memref<98xf32, #tpu.memory_space<smem>>
    %275 = vector.broadcast %274 : f32 to vector<16x128xf32>
    %276 = arith.mulf %275, %269 : vector<16x128xf32>
    %277 = arith.addf %247, %276 : vector<16x128xf32>
    %c58 = arith.constant 58 : index
    %278 = memref.load %arg1[%c58] : memref<98xf32, #tpu.memory_space<smem>>
    %279 = vector.broadcast %278 : f32 to vector<16x128xf32>
    %280 = arith.mulf %279, %269 : vector<16x128xf32>
    %281 = arith.addf %251, %280 : vector<16x128xf32>
    %c59 = arith.constant 59 : index
    %282 = memref.load %arg1[%c59] : memref<98xf32, #tpu.memory_space<smem>>
    %283 = vector.broadcast %282 : f32 to vector<16x128xf32>
    %284 = arith.mulf %283, %269 : vector<16x128xf32>
    %285 = arith.addf %255, %284 : vector<16x128xf32>
    %c60 = arith.constant 60 : index
    %286 = memref.load %arg1[%c60] : memref<98xf32, #tpu.memory_space<smem>>
    %287 = vector.broadcast %286 : f32 to vector<16x128xf32>
    %288 = arith.mulf %287, %269 : vector<16x128xf32>
    %289 = arith.addf %259, %288 : vector<16x128xf32>
    %c61 = arith.constant 61 : index
    %290 = memref.load %arg1[%c61] : memref<98xf32, #tpu.memory_space<smem>>
    %291 = vector.broadcast %290 : f32 to vector<16x128xf32>
    %292 = arith.mulf %291, %269 : vector<16x128xf32>
    %293 = arith.addf %263, %292 : vector<16x128xf32>
    %c62 = arith.constant 62 : index
    %294 = memref.load %arg1[%c62] : memref<98xf32, #tpu.memory_space<smem>>
    %295 = vector.broadcast %294 : f32 to vector<16x128xf32>
    %296 = arith.mulf %295, %269 : vector<16x128xf32>
    %297 = arith.addf %267, %296 : vector<16x128xf32>
    %c1_i32_20 = arith.constant 1 : i32
    %298 = tpu.dynamic_rotate %21 by %c1_i32_20 dim 0 : vector<24x128xf32>, i32 -> vector<24x128xf32>
    %299 = vector.extract_strided_slice %298 {offsets = [0, 0], sizes = [16, 128], strides = [1, 1]} : vector<24x128xf32> to vector<16x128xf32>
    %c63 = arith.constant 63 : index
    %300 = memref.load %arg1[%c63] : memref<98xf32, #tpu.memory_space<smem>>
    %301 = vector.broadcast %300 : f32 to vector<16x128xf32>
    %302 = arith.mulf %301, %299 : vector<16x128xf32>
    %303 = arith.addf %273, %302 : vector<16x128xf32>
    %c64 = arith.constant 64 : index
    %304 = memref.load %arg1[%c64] : memref<98xf32, #tpu.memory_space<smem>>
    %305 = vector.broadcast %304 : f32 to vector<16x128xf32>
    %306 = arith.mulf %305, %299 : vector<16x128xf32>
    %307 = arith.addf %277, %306 : vector<16x128xf32>
    %c65 = arith.constant 65 : index
    %308 = memref.load %arg1[%c65] : memref<98xf32, #tpu.memory_space<smem>>
    %309 = vector.broadcast %308 : f32 to vector<16x128xf32>
    %310 = arith.mulf %309, %299 : vector<16x128xf32>
    %311 = arith.addf %281, %310 : vector<16x128xf32>
    %c66 = arith.constant 66 : index
    %312 = memref.load %arg1[%c66] : memref<98xf32, #tpu.memory_space<smem>>
    %313 = vector.broadcast %312 : f32 to vector<16x128xf32>
    %314 = arith.mulf %313, %299 : vector<16x128xf32>
    %315 = arith.addf %285, %314 : vector<16x128xf32>
    %c67 = arith.constant 67 : index
    %316 = memref.load %arg1[%c67] : memref<98xf32, #tpu.memory_space<smem>>
    %317 = vector.broadcast %316 : f32 to vector<16x128xf32>
    %318 = arith.mulf %317, %299 : vector<16x128xf32>
    %319 = arith.addf %289, %318 : vector<16x128xf32>
    %c68 = arith.constant 68 : index
    %320 = memref.load %arg1[%c68] : memref<98xf32, #tpu.memory_space<smem>>
    %321 = vector.broadcast %320 : f32 to vector<16x128xf32>
    %322 = arith.mulf %321, %299 : vector<16x128xf32>
    %323 = arith.addf %293, %322 : vector<16x128xf32>
    %c69 = arith.constant 69 : index
    %324 = memref.load %arg1[%c69] : memref<98xf32, #tpu.memory_space<smem>>
    %325 = vector.broadcast %324 : f32 to vector<16x128xf32>
    %326 = arith.mulf %325, %299 : vector<16x128xf32>
    %327 = arith.addf %297, %326 : vector<16x128xf32>
    %328 = vector.extract_strided_slice %21 {offsets = [0, 0], sizes = [16, 128], strides = [1, 1]} : vector<24x128xf32> to vector<16x128xf32>
    %c70 = arith.constant 70 : index
    %329 = memref.load %arg1[%c70] : memref<98xf32, #tpu.memory_space<smem>>
    %330 = vector.broadcast %329 : f32 to vector<16x128xf32>
    %331 = arith.mulf %330, %328 : vector<16x128xf32>
    %332 = arith.addf %303, %331 : vector<16x128xf32>
    %c71 = arith.constant 71 : index
    %333 = memref.load %arg1[%c71] : memref<98xf32, #tpu.memory_space<smem>>
    %334 = vector.broadcast %333 : f32 to vector<16x128xf32>
    %335 = arith.mulf %334, %328 : vector<16x128xf32>
    %336 = arith.addf %307, %335 : vector<16x128xf32>
    %c72 = arith.constant 72 : index
    %337 = memref.load %arg1[%c72] : memref<98xf32, #tpu.memory_space<smem>>
    %338 = vector.broadcast %337 : f32 to vector<16x128xf32>
    %339 = arith.mulf %338, %328 : vector<16x128xf32>
    %340 = arith.addf %311, %339 : vector<16x128xf32>
    %c73 = arith.constant 73 : index
    %341 = memref.load %arg1[%c73] : memref<98xf32, #tpu.memory_space<smem>>
    %342 = vector.broadcast %341 : f32 to vector<16x128xf32>
    %343 = arith.mulf %342, %328 : vector<16x128xf32>
    %344 = arith.addf %315, %343 : vector<16x128xf32>
    %c74 = arith.constant 74 : index
    %345 = memref.load %arg1[%c74] : memref<98xf32, #tpu.memory_space<smem>>
    %346 = vector.broadcast %345 : f32 to vector<16x128xf32>
    %347 = arith.mulf %346, %328 : vector<16x128xf32>
    %348 = arith.addf %319, %347 : vector<16x128xf32>
    %c75 = arith.constant 75 : index
    %349 = memref.load %arg1[%c75] : memref<98xf32, #tpu.memory_space<smem>>
    %350 = vector.broadcast %349 : f32 to vector<16x128xf32>
    %351 = arith.mulf %350, %328 : vector<16x128xf32>
    %352 = arith.addf %323, %351 : vector<16x128xf32>
    %c76 = arith.constant 76 : index
    %353 = memref.load %arg1[%c76] : memref<98xf32, #tpu.memory_space<smem>>
    %354 = vector.broadcast %353 : f32 to vector<16x128xf32>
    %355 = arith.mulf %354, %328 : vector<16x128xf32>
    %356 = arith.addf %327, %355 : vector<16x128xf32>
    %c23_i32_21 = arith.constant 23 : i32
    %357 = tpu.dynamic_rotate %21 by %c23_i32_21 dim 0 : vector<24x128xf32>, i32 -> vector<24x128xf32>
    %358 = vector.extract_strided_slice %357 {offsets = [0, 0], sizes = [16, 128], strides = [1, 1]} : vector<24x128xf32> to vector<16x128xf32>
    %c77 = arith.constant 77 : index
    %359 = memref.load %arg1[%c77] : memref<98xf32, #tpu.memory_space<smem>>
    %360 = vector.broadcast %359 : f32 to vector<16x128xf32>
    %361 = arith.mulf %360, %358 : vector<16x128xf32>
    %362 = arith.addf %332, %361 : vector<16x128xf32>
    %c78 = arith.constant 78 : index
    %363 = memref.load %arg1[%c78] : memref<98xf32, #tpu.memory_space<smem>>
    %364 = vector.broadcast %363 : f32 to vector<16x128xf32>
    %365 = arith.mulf %364, %358 : vector<16x128xf32>
    %366 = arith.addf %336, %365 : vector<16x128xf32>
    %c79 = arith.constant 79 : index
    %367 = memref.load %arg1[%c79] : memref<98xf32, #tpu.memory_space<smem>>
    %368 = vector.broadcast %367 : f32 to vector<16x128xf32>
    %369 = arith.mulf %368, %358 : vector<16x128xf32>
    %370 = arith.addf %340, %369 : vector<16x128xf32>
    %c80 = arith.constant 80 : index
    %371 = memref.load %arg1[%c80] : memref<98xf32, #tpu.memory_space<smem>>
    %372 = vector.broadcast %371 : f32 to vector<16x128xf32>
    %373 = arith.mulf %372, %358 : vector<16x128xf32>
    %374 = arith.addf %344, %373 : vector<16x128xf32>
    %c81 = arith.constant 81 : index
    %375 = memref.load %arg1[%c81] : memref<98xf32, #tpu.memory_space<smem>>
    %376 = vector.broadcast %375 : f32 to vector<16x128xf32>
    %377 = arith.mulf %376, %358 : vector<16x128xf32>
    %378 = arith.addf %348, %377 : vector<16x128xf32>
    %c82 = arith.constant 82 : index
    %379 = memref.load %arg1[%c82] : memref<98xf32, #tpu.memory_space<smem>>
    %380 = vector.broadcast %379 : f32 to vector<16x128xf32>
    %381 = arith.mulf %380, %358 : vector<16x128xf32>
    %382 = arith.addf %352, %381 : vector<16x128xf32>
    %c83 = arith.constant 83 : index
    %383 = memref.load %arg1[%c83] : memref<98xf32, #tpu.memory_space<smem>>
    %384 = vector.broadcast %383 : f32 to vector<16x128xf32>
    %385 = arith.mulf %384, %358 : vector<16x128xf32>
    %386 = arith.addf %356, %385 : vector<16x128xf32>
    %c22_i32_22 = arith.constant 22 : i32
    %387 = tpu.dynamic_rotate %21 by %c22_i32_22 dim 0 : vector<24x128xf32>, i32 -> vector<24x128xf32>
    %388 = vector.extract_strided_slice %387 {offsets = [0, 0], sizes = [16, 128], strides = [1, 1]} : vector<24x128xf32> to vector<16x128xf32>
    %c84 = arith.constant 84 : index
    %389 = memref.load %arg1[%c84] : memref<98xf32, #tpu.memory_space<smem>>
    %390 = vector.broadcast %389 : f32 to vector<16x128xf32>
    %391 = arith.mulf %390, %388 : vector<16x128xf32>
    %392 = arith.addf %362, %391 : vector<16x128xf32>
    %c85 = arith.constant 85 : index
    %393 = memref.load %arg1[%c85] : memref<98xf32, #tpu.memory_space<smem>>
    %394 = vector.broadcast %393 : f32 to vector<16x128xf32>
    %395 = arith.mulf %394, %388 : vector<16x128xf32>
    %396 = arith.addf %366, %395 : vector<16x128xf32>
    %c86 = arith.constant 86 : index
    %397 = memref.load %arg1[%c86] : memref<98xf32, #tpu.memory_space<smem>>
    %398 = vector.broadcast %397 : f32 to vector<16x128xf32>
    %399 = arith.mulf %398, %388 : vector<16x128xf32>
    %400 = arith.addf %370, %399 : vector<16x128xf32>
    %c87 = arith.constant 87 : index
    %401 = memref.load %arg1[%c87] : memref<98xf32, #tpu.memory_space<smem>>
    %402 = vector.broadcast %401 : f32 to vector<16x128xf32>
    %403 = arith.mulf %402, %388 : vector<16x128xf32>
    %404 = arith.addf %374, %403 : vector<16x128xf32>
    %c88 = arith.constant 88 : index
    %405 = memref.load %arg1[%c88] : memref<98xf32, #tpu.memory_space<smem>>
    %406 = vector.broadcast %405 : f32 to vector<16x128xf32>
    %407 = arith.mulf %406, %388 : vector<16x128xf32>
    %408 = arith.addf %378, %407 : vector<16x128xf32>
    %c89 = arith.constant 89 : index
    %409 = memref.load %arg1[%c89] : memref<98xf32, #tpu.memory_space<smem>>
    %410 = vector.broadcast %409 : f32 to vector<16x128xf32>
    %411 = arith.mulf %410, %388 : vector<16x128xf32>
    %412 = arith.addf %382, %411 : vector<16x128xf32>
    %c90 = arith.constant 90 : index
    %413 = memref.load %arg1[%c90] : memref<98xf32, #tpu.memory_space<smem>>
    %414 = vector.broadcast %413 : f32 to vector<16x128xf32>
    %415 = arith.mulf %414, %388 : vector<16x128xf32>
    %416 = arith.addf %386, %415 : vector<16x128xf32>
    %c21_i32_23 = arith.constant 21 : i32
    %417 = tpu.dynamic_rotate %21 by %c21_i32_23 dim 0 : vector<24x128xf32>, i32 -> vector<24x128xf32>
    %418 = vector.extract_strided_slice %417 {offsets = [0, 0], sizes = [16, 128], strides = [1, 1]} : vector<24x128xf32> to vector<16x128xf32>
    %c91 = arith.constant 91 : index
    %419 = memref.load %arg1[%c91] : memref<98xf32, #tpu.memory_space<smem>>
    %420 = vector.broadcast %419 : f32 to vector<16x128xf32>
    %421 = arith.mulf %420, %418 : vector<16x128xf32>
    %422 = arith.addf %392, %421 : vector<16x128xf32>
    %c92 = arith.constant 92 : index
    %423 = memref.load %arg1[%c92] : memref<98xf32, #tpu.memory_space<smem>>
    %424 = vector.broadcast %423 : f32 to vector<16x128xf32>
    %425 = arith.mulf %424, %418 : vector<16x128xf32>
    %426 = arith.addf %396, %425 : vector<16x128xf32>
    %c93 = arith.constant 93 : index
    %427 = memref.load %arg1[%c93] : memref<98xf32, #tpu.memory_space<smem>>
    %428 = vector.broadcast %427 : f32 to vector<16x128xf32>
    %429 = arith.mulf %428, %418 : vector<16x128xf32>
    %430 = arith.addf %400, %429 : vector<16x128xf32>
    %c94 = arith.constant 94 : index
    %431 = memref.load %arg1[%c94] : memref<98xf32, #tpu.memory_space<smem>>
    %432 = vector.broadcast %431 : f32 to vector<16x128xf32>
    %433 = arith.mulf %432, %418 : vector<16x128xf32>
    %434 = arith.addf %404, %433 : vector<16x128xf32>
    %c95 = arith.constant 95 : index
    %435 = memref.load %arg1[%c95] : memref<98xf32, #tpu.memory_space<smem>>
    %436 = vector.broadcast %435 : f32 to vector<16x128xf32>
    %437 = arith.mulf %436, %418 : vector<16x128xf32>
    %438 = arith.addf %408, %437 : vector<16x128xf32>
    %c96 = arith.constant 96 : index
    %439 = memref.load %arg1[%c96] : memref<98xf32, #tpu.memory_space<smem>>
    %440 = vector.broadcast %439 : f32 to vector<16x128xf32>
    %441 = arith.mulf %440, %418 : vector<16x128xf32>
    %442 = arith.addf %412, %441 : vector<16x128xf32>
    %c97 = arith.constant 97 : index
    %443 = memref.load %arg1[%c97] : memref<98xf32, #tpu.memory_space<smem>>
    %444 = vector.broadcast %443 : f32 to vector<16x128xf32>
    %445 = arith.mulf %444, %418 : vector<16x128xf32>
    %446 = arith.addf %416, %445 : vector<16x128xf32>
    %cst_24 = arith.constant 0.000000e+00 : f32
    %447 = vector.broadcast %cst_24 : f32 to vector<16x128xf32>
    %c3_i32_25 = arith.constant 3 : i32
    %448 = tpu.dynamic_rotate %422 by %c3_i32_25 dim 1 : vector<16x128xf32>, i32 -> vector<16x128xf32>
    %449 = arith.addf %447, %448 : vector<16x128xf32>
    %c2_i32_26 = arith.constant 2 : i32
    %450 = tpu.dynamic_rotate %426 by %c2_i32_26 dim 1 : vector<16x128xf32>, i32 -> vector<16x128xf32>
    %451 = arith.addf %449, %450 : vector<16x128xf32>
    %c1_i32_27 = arith.constant 1 : i32
    %452 = tpu.dynamic_rotate %430 by %c1_i32_27 dim 1 : vector<16x128xf32>, i32 -> vector<16x128xf32>
    %453 = arith.addf %451, %452 : vector<16x128xf32>
    %454 = arith.addf %453, %434 : vector<16x128xf32>
    %c127_i32 = arith.constant 127 : i32
    %455 = tpu.dynamic_rotate %438 by %c127_i32 dim 1 : vector<16x128xf32>, i32 -> vector<16x128xf32>
    %456 = arith.addf %454, %455 : vector<16x128xf32>
    %c126_i32 = arith.constant 126 : i32
    %457 = tpu.dynamic_rotate %442 by %c126_i32 dim 1 : vector<16x128xf32>, i32 -> vector<16x128xf32>
    %458 = arith.addf %456, %457 : vector<16x128xf32>
    %c125_i32 = arith.constant 125 : i32
    %459 = tpu.dynamic_rotate %446 by %c125_i32 dim 1 : vector<16x128xf32>, i32 -> vector<16x128xf32>
    %460 = arith.addf %458, %459 : vector<16x128xf32>
    %cst_28 = arith.constant 0.000000e+00 : f32
    %461 = vector.broadcast %cst_28 : f32 to vector<16x128xf32>
    %462 = arith.subf %461, %460 : vector<16x128xf32>
    %463 = math.exp %462 : vector<16x128xf32>
    %cst_29 = arith.constant 1.000000e+00 : f32
    %464 = vector.broadcast %cst_29 : f32 to vector<16x128xf32>
    %465 = arith.addf %464, %463 : vector<16x128xf32>
    %cst_30 = arith.constant 1.000000e+00 : f32
    %466 = vector.broadcast %cst_30 : f32 to vector<16x128xf32>
    %467 = arith.divf %466, %465 : vector<16x128xf32>
    %468 = vector.extract_strided_slice %467 {offsets = [0, 0], sizes = [16, 16], strides = [1, 1]} : vector<16x128xf32> to vector<16x16xf32>
    %c0_31 = arith.constant 0 : index
    %c0_32 = arith.constant 0 : index
    %c0_33 = arith.constant 0 : index
    %c0_34 = arith.constant 0 : index
    %469 = vector.load %arg3[%c0_31, %c0_32, %c0_33, %c0_34] : memref<2x1x16x16xf32, #tpu.memory_space<vmem>>, vector<1x1x16x16xf32>
    %470 = vector.shape_cast %469 : vector<1x1x16x16xf32> to vector<16x16xf32>
    %471 = vector.shape_cast %468 : vector<16x16xf32> to vector<1x1x16x16xf32>
    tpu.vector_store %arg3[%c0_31, %c0_32, %c0_33, %c0_34], %471 {strides = array<i32>} : memref<2x1x16x16xf32, #tpu.memory_space<vmem>>, vector<1x1x16x16xf32>,
    %472 = vector.extract_strided_slice %467 {offsets = [0, 22], sizes = [16, 16], strides = [1, 1]} : vector<16x128xf32> to vector<16x16xf32>
    %c1_35 = arith.constant 1 : index
    %c0_36 = arith.constant 0 : index
    %c0_37 = arith.constant 0 : index
    %c0_38 = arith.constant 0 : index
    %473 = vector.load %arg3[%c1_35, %c0_36, %c0_37, %c0_38] : memref<2x1x16x16xf32, #tpu.memory_space<vmem>>, vector<1x1x16x16xf32>
    %474 = vector.shape_cast %473 : vector<1x1x16x16xf32> to vector<16x16xf32>
    %475 = vector.shape_cast %472 : vector<16x16xf32> to vector<1x1x16x16xf32>
    tpu.vector_store %arg3[%c1_35, %c0_36, %c0_37, %c0_38], %475 {strides = array<i32>} : memref<2x1x16x16xf32, #tpu.memory_space<vmem>>, vector<1x1x16x16xf32>,
    return
  }
  func.func @transform_0(%arg0: i32) -> i32 {
    %c0_i32 = arith.constant 0 : i32
    %c0_i32_0 = arith.constant 0 : i32
    return %c0_i32 : i32
  }
  func.func @transform_1(%arg0: i32) -> (i32, i32, i32, i32) {
    %c0_i32 = arith.constant 0 : i32
    %c0_i32_0 = arith.constant 0 : i32
    %c0_i32_1 = arith.constant 0 : i32
    %c0_i32_2 = arith.constant 0 : i32
    return %arg0, %c0_i32, %c0_i32_0, %c0_i32_1 : i32, i32, i32, i32
  }
  func.func @transform_2(%arg0: i32) -> (i32, i32, i32, i32) {
    %c0_i32 = arith.constant 0 : i32
    %c0_i32_0 = arith.constant 0 : i32
    %c0_i32_1 = arith.constant 0 : i32
    %c0_i32_2 = arith.constant 0 : i32
    return %arg0, %c0_i32, %c0_i32_0, %c0_i32_1 : i32, i32, i32, i32
  }
}

</mosaic_0001>

<bundles_post_ra>
// kernel: tpu_custom_call.1
= control target key start
LH: loop header
LB: loop body
LE: loop exit
PB: predicated region body
PF: predicated region fallthrough
CT: control target
= control target key end

     0   :  { %s2137_s0 = inlined_call_operand.hbm [shape: f32[98], index: 0, kind: input, shape index: {}]   ;;  %s2138_s1 = inlined_call_operand.hbm [shape: f32[2,4,16,16], index: 1, kind: input, shape index: {}]   ;;  %s2139_s2 = inlined_call_operand.hbm [shape: f32[2,1,16,16], index: 2, kind: output, shape index: {}]  }
   0x1   :  { %2276 = sst [smem:[#allocation80_spill]] %s2139_s2 }
   0x2   :  { %7 = vsyncpa [#allocation5], 0 }
   0x3   :  { %8 = vsyncpa [#allocation3], 0 }
   0x4   :  { %9 = vsyncpa [#allocation4], 0  ;;  %s1046_s9 = smov [#allocation2]   ;;  %s1047_s12 = smov [#allocation6]  }
   0x5   :  { %17 = dma.hbm_to_smem %s2137_s0, 16, %s1046_s9, [#allocation5]  }
   0x6   :  { %s23_s13 = sshll.u32 %s1047_s12, 4  ;;  %s24_s13 = int_to_ptr.vmem [resolvable:$true] %s23_s13 }
   0x7   :  { %s1008_s14 = scalar_lea.vmem %s24_s13, 2048  ;;  %p1013_p1 = scmp.lt.s32.totalorder %s24_s13, %s24_s13 }
   0x8   :  { %p1009_p0 = scmp.ne.s32.totalorder %s24_s13, %s1008_s14  ;;  %p1014_p2 = scmp.lt.s32.totalorder %s1008_s14, %s1008_s14 }
   0xa   :  { %p1015_p3 = por %p1014_p2, %p1013_p1 }
   0xc   :  { %p1016_p4 = pnand %p1015_p3, %p1009_p0 }
   0xe   :  { %1019 = shalt.err (!%p1016_p4)
}
   0xf   :  { %s2140_s15 = smov 128   ;;  %s2141_s16 = smov 8  }
  0x10   :  { %29 = dma.hbm_to_vmem [thread:$0]  %s2138_s1, 2048, %s24_s13, [#allocation3], %s2140_s15, %s2140_s15, %s2141_s16  }
  0x11   :  { %1040 = dma.done.wait [#allocation5], 16  }
  0x12   :  { %1041 = vsyncadd [#allocation5], 4294967280 }
  0x13   :  { %1042 = dma.done.wait [#allocation3], 2048  }
  0x14   :  { %1043 = vsyncadd [#allocation3], 4294965248 }
  0x15   :  { %36 = sfence }
  0x16   :  { %v45_v0 = vld [vmem:[#allocation6 + $0x40] sm:$0xff]  ;;  %v47_v1 = vld [vmem:[#allocation6 + $0x50] sm:$0xff]  ;;  %vm53_vm0 = vcmask 130048   ;;  %v46_v7 = vld [vmem:[#allocation6 + $0x48] sm:$0xff]  ;;  %s1050_s0 = smov 22   ;;  %s1099_s1 = sld [smem:[#allocation2]] }
  0x17   :  { %v49_v2 = vld [vmem:[#allocation6 + $0x60] sm:$0xff]  ;;  %v51_v3 = vld [vmem:[#allocation6 + $0x70] sm:$0xff]  ;;  %v68_v4 = vsel %vm53_vm0, %v45_v0, 0.0  ;;  %v69_v5 = vsel %vm53_vm0, %v47_v1, 0.0  ;;  %v48_v8 = vld [vmem:[#allocation6 + $0x58] sm:$0xff]  ;;  %v75_v12 = vsel %vm53_vm0, %v46_v7, 0.0 }
  0x18   :  { %v71_v6 = vsel %vm53_vm0, %v49_v2, 0.0  ;;  %v70_v9 = vadd.f32 %v69_v5, %v68_v4  ;;  %v50_v10 = vld [vmem:[#allocation6 + $0x68] sm:$0xff]  ;;  %v52_v11 = vld [vmem:[#allocation6 + $0x78] sm:$0xff]  ;;  %v76_v13 = vsel %vm53_vm0, %v48_v8, 0.0  ;;  %v73_v14 = vsel %vm53_vm0, %v51_v3, 0.0  ;;  %s1101_s19 = sld [smem:[#allocation2 + $0x7]] }
  0x19   :  { %v77_v15 = vadd.f32 %v76_v13, %v75_v12  ;;  %v78_v16 = vsel %vm53_vm0, %v50_v10, 0.0  ;;  %v100_v17 = vsel %vm53_vm0, %v45_v0, -inf  ;;  %v80_v19 = vsel %vm53_vm0, %v52_v11, 0.0  ;;  %s1103_s20 = sld [smem:[#allocation2 + $0xe]]  ;;  %v37_v38 = vld [vmem:[#allocation6] sm:$0xff]  ;;  %v39_v39 = vld [vmem:[#allocation6 + $0x10] sm:$0xff] }
  0x1a   :  { %v72_v18 = vadd.f32 %v71_v6, %v70_v9  ;;  %v101_v20 = vsel %vm53_vm0, %v47_v1, -inf  ;;  %v103_v21 = vsel %vm53_vm0, %v49_v2, -inf  ;;  %v107_v24 = vsel %vm53_vm0, %v46_v7, -inf  ;;  %s1105_s21 = sld [smem:[#allocation2 + $0x15]]  ;;  %v38_v40 = vld [vmem:[#allocation6 + $0x8] sm:$0xff]  ;;  %v40_v41 = vld [vmem:[#allocation6 + $0x18] sm:$0xff] }
  0x1b   :  { %v79_v22 = vadd.f32 %v78_v16, %v77_v15  ;;  %v102_v23 = vmax.f32 %v100_v17, %v101_v20  ;;  %v108_v25 = vsel %vm53_vm0, %v48_v8, -inf  ;;  %v105_v27 = vsel %vm53_vm0, %v51_v3, -inf  ;;  %s1107_s22 = sld [smem:[#allocation2 + $0x1c]]  ;;  %v41_v44 = vld [vmem:[#allocation6 + $0x20] sm:$0xff]  ;;  %v42_v47 = vld [vmem:[#allocation6 + $0x28] sm:$0xff]  ;;  %v43_v51 = vld [vmem:[#allocation6 + $0x30] sm:$0xff] }
  0x1c   :  { %v74_v26 = vadd.f32 %v73_v14, %v72_v18  ;;  %v109_v28 = vmax.f32 %v107_v24, %v108_v25  ;;  %v110_v29 = vsel %vm53_vm0, %v50_v10, -inf  ;;  %v112_v34 = vsel %vm53_vm0, %v52_v11, -inf  ;;  %2277 = sst [smem:[#allocation11_spill]] %s1099_s1  ;;  %v44_v55 = vld [vmem:[#allocation6 + $0x38] sm:$0xff] }
  0x1d   :  { %v81_v30 = vadd.f32 %v80_v19, %v79_v22  ;;  %v104_v31 = vmax.f32 %v102_v23, %v103_v21  ;;  %s1109_s23 = sld [smem:[#allocation2 + $0x23]]  ;;  %v54_v42 = vsel %vm53_vm0, %v37_v38, 0.0  ;;  %v55_v43 = vsel %vm53_vm0, %v39_v39, 0.0 }
  0x1e   :  { %v84_v32 = vmul.f32 0.25, %v74_v26  ;;  %v111_v33 = vmax.f32 %v109_v28, %v110_v29  ;;  %2278 = sst [smem:[#allocation12_spill]] %s1101_s19  ;;  %v61_v45 = vsel %vm53_vm0, %v38_v40, 0.0  ;;  %v62_v46 = vsel %vm53_vm0, %v40_v41, 0.0 }
  0x1f   :  { %v106_v35 = vmax.f32 %v104_v31, %v105_v27  ;;  %v85_v36 = vmul.f32 0.25, %v81_v30  ;;  %2279 = sst [smem:[#allocation13_spill]] %s1103_s20  ;;  %v56_v48 = vadd.f32 %v55_v43, %v54_v42  ;;  %v57_v49 = vsel %vm53_vm0, %v41_v44, 0.0 }
  0x20   :  { %116 = vrot.lane.b32.xlu0 %v84_v32, %s1050_s0  ;;  %v113_v37 = vmax.f32 %v111_v33, %v112_v34  ;;  %2280 = sst [smem:[#allocation14_spill]] %s1105_s21  ;;  %v63_v50 = vadd.f32 %v62_v46, %v61_v45  ;;  %v64_v52 = vsel %vm53_vm0, %v42_v47, 0.0  ;;  %v86_v53 = vsel %vm53_vm0, %v37_v38, -inf }
  0x21   :  { %135 = vrot.lane.b32.xlu1 %v106_v35, %s1050_s0  ;;  %2281 = sst [smem:[#allocation15_spill]] %s1107_s22  ;;  %v87_v54 = vsel %vm53_vm0, %v39_v39, -inf  ;;  %v93_v56 = vsel %vm53_vm0, %v38_v40, -inf  ;;  %v94_v57 = vsel %vm53_vm0, %v40_v41, -inf  ;;  %v58_v58 = vadd.f32 %v57_v49, %v56_v48 }
  0x22   :  { %s1111_s24 = sld [smem:[#allocation2 + $0x2a]]  ;;  %v59_v59 = vsel %vm53_vm0, %v43_v51, 0.0  ;;  %v65_v60 = vadd.f32 %v64_v52, %v63_v50  ;;  %v88_v61 = vmax.f32 %v86_v53, %v87_v54  ;;  %v66_v62 = vsel %vm53_vm0, %v44_v55, 0.0 }
  0x23   :  { %2282 = sst [smem:[#allocation16_spill]] %s1109_s23  ;;  %v89_v63 = vsel %vm53_vm0, %v41_v44, -inf  ;;  %v95_v0 = vmax.f32 %v93_v56, %v94_v57  ;;  %v96_v1 = vsel %vm53_vm0, %v42_v47, -inf  ;;  %v60_v2 = vadd.f32 %v59_v59, %v58_v58 }
  0x24   :  { %118 = vrot.lane.b32.xlu0 %v85_v36, %s1050_s0  ;;  %s1113_s25 = sld [smem:[#allocation2 + $0x46]]  ;;  %v67_v3 = vadd.f32 %v66_v62, %v65_v60  ;;  %v90_v4 = vmax.f32 %v88_v61, %v89_v63  ;;  %v91_v5 = vsel %vm53_vm0, %v43_v51, -inf  ;;  %v98_v7 = vsel %vm53_vm0, %v44_v55, -inf }
  0x25   :  { %137 = vrot.lane.b32.xlu1 %v113_v37, %s1050_s0  ;;  %s1115_s26 = sld [smem:[#allocation2 + $0x1]]  ;;  %v97_v6 = vmax.f32 %v95_v0, %v96_v1  ;;  %v151_v8 = vlaneseq  ;;  %v82_v9 = vmul.f32 0.25, %v60_v2  ;;  %v157_v15 = vstv %s1099_s1 }
  0x26   :  { %s1117_s27 = sld [smem:[#allocation2 + $0x31]]  ;;  %v83_v10 = vmul.f32 0.25, %v67_v3  ;;  %v92_v11 = vmax.f32 %v90_v4, %v91_v5  ;;  %v204_v16 = vstv %s1101_s19  ;;  %v251_v17 = vstv %s1103_s20 }
  0x27   :  { %s1119_s28 = sld [smem:[#allocation2 + $0x38]]  ;;  %v99_v12 = vmax.f32 %v97_v6, %v98_v7  ;;  %v1227_v13 = vshrl.u32 %v151_v8, 7  ;;  %v1232_v14 = vsel %vm53_vm0, %v82_v9, 0.0  ;;  %v293_v20 = vstv %s1105_s21 }
  0x28   :  { %2283 = sst [smem:[#allocation17_spill]] %s1111_s24  ;;  %v1240_v18 = vsel %vm53_vm0, %v83_v10, 0.0  ;;  %v1243_v19 = vsel %vm53_vm0, %v92_v11, 0.0  ;;  %v340_v21 = vstv %s1107_s22  ;;  %v387_v23 = vstv %s1109_s23 }
  0x29   :  { %s1121_s29 = sld [smem:[#allocation2 + $0x3f]]  ;;  %v1250_v22 = vsel %vm53_vm0, %v99_v12, 0.0  ;;  %v2261_v24 = vstv %s1111_s24  ;;  %vm124_vm1 = vcmask 179200   ;;  %vm127_vm2 = vcmask 310272  }
  0x2a   :  { %2284 = sst [smem:[#allocation18_spill]] %s1113_s25  ;;  %v614_v28 = vstv %s1113_s25  ;;  %vm130_vm3 = vcmask 359424   ;;  %vm153_vm4 = vcmp.lt.s32.totalorder %v1227_v13, 3  ;;  %vm200_vm5 = vcmp.lt.s32.totalorder %v1227_v13, 2 }
  0x2b   :  { %2285 = sst [smem:[#allocation19_spill]] %s1115_s26  ;;  %v2256_v29 = vstv %s1115_s26  ;;  %vm247_vm6 = vcmp.lt.s32.totalorder %v1227_v13, 1  ;;  %vm336_vm7 = vcmp.lt.s32.totalorder %v1227_v13, 7  ;;  %vm383_vm8 = vcmp.lt.s32.totalorder %v1227_v13, 6 }
  0x2c   :  { %2286 = sst [smem:[#allocation20_spill]] %s1117_s27  ;;  %v2253_v25 = vstv %s1117_s27  ;;  %vm430_vm9 = vcmp.lt.s32.totalorder %v1227_v13, 5 }
  0x2d   :  { %2287 = sst [smem:[#allocation21_spill]] %s1119_s28  ;;  %v526_v26 = vstv %s1119_s28 }
  0x2e   :  { %s1123_s30 = sld [smem:[#allocation2 + $0x4d]] }
  0x2f   :  { %2288 = sst [smem:[#allocation22_spill]] %s1121_s29  ;;  %v572_v27 = vstv %s1121_s29 }
  0x30   :  { %s1125_s3 = sld [smem:[#allocation2 + $0x54]] }
  0x31   :  { %s1127_s4 = sld [smem:[#allocation2 + $0x5b]] }
  0x32   :  { %s1129_s5 = sld [smem:[#allocation2 + $0x8]] }
  0x33   :  { %s1131_s6 = sld [smem:[#allocation2 + $0xf]] }
  0x34   :  { %2289 = sst [smem:[#allocation23_spill]] %s1123_s30  ;;  %v660_v30 = vstv %s1123_s30 }
  0x35   :  { %s1133_s7 = sld [smem:[#allocation2 + $0x16]] }
  0x36   :  { %2290 = sst [smem:[#allocation24_spill]] %s1125_s3  ;;  %v706_v31 = vstv %s1125_s3 }
  0x37   :  { %2291 = sst [smem:[#allocation25_spill]] %s1127_s4  ;;  %v752_v32 = vstv %s1127_s4 }
  0x38   :  { %2292 = sst [smem:[#allocation26_spill]] %s1129_s5  ;;  %v2257_v33 = vstv %s1129_s5 }
  0x39   :  { %2293 = sst [smem:[#allocation27_spill]] %s1131_s6  ;;  %v257_v34 = vstv %s1131_s6 }
  0x3a   :  { %s1135_s8 = sld [smem:[#allocation2 + $0x1d]] }
  0x3b   :  { %2294 = sst [smem:[#allocation28_spill]] %s1133_s7  ;;  %v299_v35 = vstv %s1133_s7 }
  0x3c   :  { %s1137_s9 = sld [smem:[#allocation2 + $0x24]] }
  0x3d   :  { %s1139_s10 = sld [smem:[#allocation2 + $0x2b]] }
  0x3e   :  { %s1141_s11 = sld [smem:[#allocation2 + $0x32]] }
  0x3f   :  { %s1143_s12 = sld [smem:[#allocation2 + $0x39]] }
  0x40   :  { %2295 = sst [smem:[#allocation29_spill]] %s1135_s8  ;;  %v2268_v36 = vstv %s1135_s8 }
  0x41   :  { %s1145_s13 = sld [smem:[#allocation2 + $0x40]] }
  0x42   :  { %2296 = sst [smem:[#allocation30_spill]] %s1137_s9  ;;  %v2269_v37 = vstv %s1137_s9 }
  0x43   :  { %2297 = sst [smem:[#allocation31_spill]] %s1139_s10 }
  0x44   :  { %2298 = sst [smem:[#allocation32_spill]] %s1141_s11 }
  0x45   :  { %2299 = sst [smem:[#allocation33_spill]] %s1143_s12 }
  0x46   :  { %s1147_s14 = sld [smem:[#allocation2 + $0x47]] }
  0x47   :  { %2300 = sst [smem:[#allocation34_spill]] %s1145_s13 }
  0x48   :  { %s1149_s17 = sld [smem:[#allocation2 + $0x4e]] }
  0x49   :  { %s1151_s18 = sld [smem:[#allocation2 + $0x55]] }
  0x4a   :  { %s1153_s0 = sld [smem:[#allocation2 + $0x5c]] }
  0x4b   :  { %s1155_s15 = sld [smem:[#allocation2 + $0x2]] }
  0x4c   :  { %2301 = sst [smem:[#allocation35_spill]] %s1147_s14  ;;  %v620_v42 = vstv %s1147_s14 }
  0x4d   :  { %s1157_s16 = sld [smem:[#allocation2 + $0x9]] }
  0x4e   :  { %2302 = sst [smem:[#allocation36_spill]] %s1149_s17 }
  0x4f   :  { %2303 = sst [smem:[#allocation37_spill]] %s1151_s18  ;;  %v712_v44 = vstv %s1151_s18 }
  0x50   :  { %2304 = sst [smem:[#allocation38_spill]] %s1153_s0 }
  0x51   :  { %2305 = sst [smem:[#allocation39_spill]] %s1155_s15 }
  0x52   :  { %s1159_s2 = sld [smem:[#allocation2 + $0x10]] }
  0x53   :  { %2306 = sst [smem:[#allocation40_spill]] %s1157_s16  ;;  %v216_v47 = vstv %s1157_s16 }
  0x54   :  { %s1161_s10 = sld [smem:[#allocation2 + $0x17]] }
  0x55   :  { %s1163_s11 = sld [smem:[#allocation2 + $0x1e]] }
  0x56   :  { %s1165_s12 = sld [smem:[#allocation2 + $0x25]] }
  0x57   :  { %s1167_s13 = sld [smem:[#allocation2 + $0x2c]] }
  0x58   :  { %2307 = sst [smem:[#allocation41_spill]] %s1159_s2 }
  0x59   :  { %s1169_s17 = sld [smem:[#allocation2 + $0x33]] }
  0x5a   :  { %2308 = sst [smem:[#allocation42_spill]] %s1161_s10 }
  0x5b   :  { %s1171_s0 = sld [smem:[#allocation2 + $0x3a]] }
  0x5c   :  { %s1173_s15 = sld [smem:[#allocation2 + $0x41]] }
  0x5d   :  { %2309 = sst [smem:[#allocation43_spill]] %s1167_s13 }
  0x5e   :  { %s1177_s10 = sld [smem:[#allocation2 + $0x48]] }
  0x5f   :  { %2310 = sst [smem:[#allocation44_spill]] %s1169_s17 }
  0x60   :  { %s1181_s13 = sld [smem:[#allocation2 + $0x4f]] }
  0x61   :  { %2311 = sst [smem:[#allocation45_spill]] %s1171_s0 }
  0x62   :  { %2312 = sst [smem:[#allocation46_spill]] %s1173_s15 }
  0x63   :  { %s1183_s17 = sld [smem:[#allocation2 + $0x56]] }
  0x64   :  { %2313 = sst [smem:[#allocation47_spill]] %s1177_s10 }
  0x65   :  { %s1185_s0 = sld [smem:[#allocation2 + $0x5d]] }
  0x66   :  { %2314 = sst [smem:[#allocation48_spill]] %s1181_s13 }
  0x67   :  { %s1188_s15 = sld [smem:[#allocation2 + $0x4]] }
  0x68   :  { %s1193_s10 = sld [smem:[#allocation2 + $0xb]] }
  0x69   :  { %2315 = sst [smem:[#allocation49_spill]] %s1183_s17 }
  0x6a   :  { %s1199_s17 = sld [smem:[#allocation2 + $0x19]] }
  0x6b   :  { %2316 = sst [smem:[#allocation50_spill]] %s1185_s0 }
  0x6c   :  { %s1197_s0 = sld [smem:[#allocation2 + $0x12]] }
  0x6d   :  { %2317 = sst [smem:[#allocation51_spill]] %s1188_s15 }
  0x6e   :  { %2318 = sst [smem:[#allocation52_spill]] %s1193_s10 }
  0x6f   :  { %s1202_s15 = sld [smem:[#allocation2 + $0x20]] }
  0x70   :  { %2320 = sst [smem:[#allocation54_spill]] %s1199_s17 }
  0x71   :  { %s1206_s10 = sld [smem:[#allocation2 + $0x27]] }
  0x72   :  { %2319 = sst [smem:[#allocation53_spill]] %s1197_s0 }
  0x73   :  { %s1209_s13 = sld [smem:[#allocation2 + $0x2e]] }
  0x74   :  { %s1211_s0 = sld [smem:[#allocation2 + $0x35]] }
  0x75   :  { %2321 = sst [smem:[#allocation55_spill]] %s1202_s15 }
  0x76   :  { %s1213_s17 = sld [smem:[#allocation2 + $0x3c]] }
  0x77   :  { %2322 = sst [smem:[#allocation56_spill]] %s1206_s10 }
  0x78   :  { %s1216_s15 = sld [smem:[#allocation2 + $0x43]] }
  0x79   :  { %2323 = sst [smem:[#allocation57_spill]] %s1209_s13 }
  0x7a   :  { %2324 = sst [smem:[#allocation58_spill]] %s1211_s0 }
  0x7b   :  { %s1219_s10 = sld [smem:[#allocation2 + $0x4a]] }
  0x7c   :  { %2325 = sst [smem:[#allocation59_spill]] %s1213_s17 }
  0x7d   :  { %s1221_s0 = sld [smem:[#allocation2 + $0x51]] }
  0x7e   :  { %2326 = sst [smem:[#allocation60_spill]] %s1216_s15 }
  0x7f   :  { %s1223_s17 = sld [smem:[#allocation2 + $0x58]] }
  0x80   :  { %s1225_s13 = sld [smem:[#allocation2 + $0x5f]] }
  0x81   :  { %2327 = sst [smem:[#allocation61_spill]] %s1219_s10 }
  0x82   :  { %s1229_s15 = sld [smem:[#allocation2 + $0x5]] }
  0x83   :  { %2328 = sst [smem:[#allocation62_spill]] %s1221_s0 }
  0x84   :  { %s1255_s20 = sld [smem:[#allocation2 + $0x1a]] }
  0x85   :  { %2329 = sst [smem:[#allocation63_spill]] %s1223_s17 }
  0x86   :  { %2330 = sst [smem:[#allocation64_spill]] %s1225_s13 }
  0x87   :  { %s1237_s17 = sld [smem:[#allocation2 + $0xc]] }
  0x88   :  { %2331 = sst [smem:[#allocation65_spill]] %s1229_s15 }
  0x89   :  { %s1247_s15 = sld [smem:[#allocation2 + $0x13]] }
  0x8a   :  { %2334 = sst [smem:[#allocation68_spill]] %s1255_s20 }
  0x8b   :  { %s2335_s21 = sld [smem:[#allocation31_spill]] }
  0x8c   :  { %s2336_s22 = sld [smem:[#allocation32_spill]] }
  0x8d   :  { %2332 = sst [smem:[#allocation66_spill]] %s1237_s17 }
  0x8e   :  { %s1261_s19 = sld [smem:[#allocation2 + $0x21]] }
  0x8f   :  { %2333 = sst [smem:[#allocation67_spill]] %s1247_s15 }
  0x90   :  { %s2338_s1 = sld [smem:[#allocation33_spill]] }
  0x91   :  { %s2339_s15 = sld [smem:[#allocation34_spill]]  ;;  %v2270_v38 = vstv %s2335_s21 }
  0x92   :  { %s2340_s27 = sld [smem:[#allocation36_spill]]  ;;  %v486_v39 = vstv %s2336_s22  ;;  %v117_v6 = vpop.permute.xlu0 %116 }
  0x93   :  { %s1267_s24 = sld [smem:[#allocation2 + $0x28]]  ;;  %v125_v11 = vsel %vm124_vm1, %v1232_v14, %v117_v6  ;;  %v136_v12 = vpop.permute.xlu1 %135 }
  0x94   :  { %2337 = sst [smem:[#allocation69_spill]] %s1261_s19  ;;  %v128_v2 = vsel %vm127_vm2, %v125_v11, 0.0  ;;  %v143_v4 = vsel %vm124_vm1, %v1243_v19, %v136_v12 }
  0x95   :  { %s2343_s25 = sld [smem:[#allocation39_spill]]  ;;  %v1348_v14 = vsel %vm130_vm3, %v128_v2, 0.0 }
  0x96   :  { %s1273_s26 = sld [smem:[#allocation2 + $0x2f]]  ;;  %v2272_v40 = vstv %s2338_s1  ;;  %v119_v11 = vpop.permute.xlu0 %118  ;;  %v149_v10 = vrot.slane %v1348_v14, 5  ;;  %v198_v8 = vrot.slane %v1348_v14, 6  ;;  %v245_v6 = vrot.slane %v1348_v14, 7 }
  0x97   :  { %v2271_v41 = vstv %s2339_s15  ;;  %s1279_s3 = sld [smem:[#allocation2 + $0x36]]  ;;  %v126_v7 = vsel %vm124_vm1, %v1240_v18, %v119_v11  ;;  %v138_v3 = vpop.permute.xlu1 %137  ;;  %v334_v1 = vrot.slane %v1348_v14, 1  ;;  %v294_v55 = vmul.f32 %v293_v20, %v1348_v14 }
  0x98   :  { %v666_v43 = vstv %s2340_s27  ;;  %s2349_s7 = sld [smem:[#allocation45_spill]]  ;;  %v129_v19 = vsel %vm127_vm2, %v126_v7, 0.0  ;;  %v1373_v12 = vsel %vm153_vm4, 0.0, %v149_v10  ;;  %v1377_v18 = vsel %vm200_vm5, 0.0, %v198_v8 }
  0x99   :  { %2341 = sst [smem:[#allocation70_spill]] %s1267_s24  ;;  %v1383_v5 = vsel %vm130_vm3, %v129_v19, 0.0  ;;  %v145_v7 = vsel %vm127_vm2, %v143_v4, 0.0  ;;  %v158_v9 = vmul.f32 %v157_v15, %v1373_v12  ;;  %v205_v2 = vmul.f32 %v204_v16, %v1377_v18 }
  0x9a   :  { %s2350_s8 = sld [smem:[#allocation46_spill]]  ;;  %v144_v11 = vsel %vm124_vm1, %v1250_v22, %v138_v3  ;;  %v1403_v4 = vsel %vm247_vm6, 0.0, %v245_v6  ;;  %v335_v58 = vrot.slane %v1383_v5, 1  ;;  %v382_v63 = vrot.slane %v1383_v5, 2 }
  0x9b   :  { %s1285_s6 = sld [smem:[#allocation2 + $0x3d]]  ;;  %v169_v46 = vstv %s2343_s25  ;;  %v207_v59 = vadd.f32 %v205_v2, %v158_v9  ;;  %v1408_v57 = vsel %vm130_vm3, %v145_v7, 0.0  ;;  %v252_v22 = vmul.f32 %v251_v17, %v1403_v4 }
  0x9c   :  { %2345 = sst [smem:[#allocation71_spill]] %s1273_s26  ;;  %v1417_v2 = vsel %vm336_vm7, %v334_v1, %v335_v58  ;;  %v381_v19 = vrot.slane %v1348_v14, 2  ;;  %v146_v7 = vsel %vm127_vm2, %v144_v11, 0.0  ;;  %v429_v3 = vrot.slane %v1383_v5, 3 }
  0x9d   :  { %2347 = sst [smem:[#allocation72_spill]] %s1279_s3  ;;  %v254_v62 = vadd.f32 %v252_v22, %v207_v59  ;;  %v199_v9 = vrot.slane %v1383_v5, 6  ;;  %v428_v54 = vrot.slane %v1348_v14, 3  ;;  %v475_v56 = vrot.slane %v1408_v57, 5 }
  0x9e   :  { %s2356_s15 = sld [smem:[#allocation51_spill]]  ;;  %v1430_v1 = vsel %vm383_vm8, %v381_v19, %v382_v63  ;;  %v341_v59 = vmul.f32 %v340_v21, %v1417_v2  ;;  %v1452_v60 = vsel %vm130_vm3, %v146_v7, 0.0  ;;  %v150_v22 = vrot.slane %v1383_v5, 5 }
  0x9f   :  { %s1291_s21 = sld [smem:[#allocation2 + $0x44]]  ;;  %v296_v0 = vadd.f32 %v294_v55, %v254_v62  ;;  %v1441_v61 = vsel %vm430_vm9, %v428_v54, %v429_v3  ;;  %v1447_v19 = vsel %vm153_vm4, 0.0, %v475_v56  ;;  %v2260_v55 = vrot.slane %v1408_v57, 6 }
  0xa0   :  { %s2358_s14 = sld [smem:[#allocation52_spill]]  ;;  %v388_v54 = vmul.f32 %v387_v23, %v1430_v1  ;;  %v1460_v53 = vsel %vm200_vm5, %v198_v8, %v199_v9  ;;  %v246_v52 = vrot.slane %v1383_v5, 7  ;;  %v567_v51 = vrot.slane %v1408_v57, 7 }
  0xa1   :  { %2352 = sst [smem:[#allocation45_spill]] %s1285_s6  ;;  %v343_v11 = vadd.f32 %v341_v59, %v296_v0  ;;  %v655_v62 = vrot.slane %v1408_v57, 1  ;;  %v435_v7 = vmul.f32 %v2261_v24, %v1441_v61  ;;  %v481_v0 = vmul.f32 %v2253_v25, %v1447_v19 }
  0xa2   :  { %s1299_s25 = sld [smem:[#allocation2 + $0x4b]]  ;;  %v164_v59 = vmul.f32 %v2256_v29, %v1373_v12  ;;  %v1478_v8 = vsel %vm200_vm5, 0.0, %v2260_v55  ;;  %v656_v9 = vrot.slane %v1452_v60, 1  ;;  %v702_v25 = vrot.slane %v1452_v60, 2 }
  0xa3   :  { %s1305_s6 = sld [smem:[#allocation2 + $0x52]]  ;;  %v390_v50 = vadd.f32 %v388_v54, %v343_v11  ;;  %v701_v11 = vrot.slane %v1408_v57, 2  ;;  %v211_v54 = vmul.f32 %v2257_v33, %v1377_v18  ;;  %v747_v29 = vrot.slane %v1408_v57, 3 }
  0xa4   :  { %s1311_s30 = sld [smem:[#allocation2 + $0x59]]  ;;  %v748_v48 = vrot.slane %v1452_v60, 3  ;;  %v1492_v45 = vsel %vm247_vm6, %v245_v6, %v246_v52  ;;  %v1498_v33 = vsel %vm247_vm6, 0.0, %v567_v51  ;;  %v1505_v55 = vsel %vm336_vm7, %v335_v58, 0.0 }
  0xa5   :  { %2357 = sst [smem:[#allocation46_spill]] %s1291_s21  ;;  %v437_v49 = vadd.f32 %v435_v7, %v390_v50  ;;  %v213_v50 = vadd.f32 %v211_v54, %v164_v59  ;;  %v258_v7 = vmul.f32 %v257_v34, %v1403_v4  ;;  %v527_v52 = vmul.f32 %v526_v26, %v1478_v8 }
  0xa6   :  { %s1318_s9 = sld [smem:[#allocation2 + $0x60]]  ;;  %v1514_v6 = vsel %vm153_vm4, %v149_v10, %v150_v22  ;;  %v1518_v59 = vsel %vm383_vm8, %v382_v63, 0.0  ;;  %v573_v10 = vmul.f32 %v572_v27, %v1498_v33  ;;  %v1536_v63 = vsel %vm383_vm8, %v701_v11, %v702_v25 }
  0xa7   :  { %s1324_s22 = sld [smem:[#allocation2 + $0x6]]  ;;  %v483_v24 = vadd.f32 %v481_v0, %v437_v49  ;;  %v1524_v49 = vsel %vm336_vm7, %v655_v62, %v656_v9  ;;  %v260_v58 = vadd.f32 %v258_v7, %v213_v50  ;;  %v300_v0 = vmul.f32 %v299_v35, %v1348_v14 }
  0xa8   :  { %2363 = sst [smem:[#allocation51_spill]] %s1299_s25  ;;  %v1542_v22 = vsel %vm430_vm9, %v747_v29, %v748_v48  ;;  %v159_v50 = vmul.f32 %v157_v15, %v1514_v6  ;;  %v206_v11 = vmul.f32 %v204_v16, %v1460_v53  ;;  %v1555_v7 = vsel %vm430_vm9, %v429_v3, 0.0 }
  0xa9   :  { %2368 = sst [smem:[#allocation52_spill]] %s1305_s6  ;;  %v529_v54 = vadd.f32 %v527_v52, %v483_v24  ;;  %v302_v62 = vadd.f32 %v300_v0, %v260_v58  ;;  %v347_v24 = vmul.f32 %v2268_v36, %v1417_v2  ;;  %v615_v29 = vmul.f32 %v614_v28, %v1408_v57 }
  0xaa   :  { %2369 = sst [smem:[#allocation73_spill]] %s1311_s30  ;;  %v661_v58 = vmul.f32 %v660_v30, %v1524_v49  ;;  %v394_v15 = vmul.f32 %v2269_v37, %v1430_v1  ;;  %v208_v36 = vadd.f32 %v206_v11, %v159_v50  ;;  %v253_v16 = vmul.f32 %v251_v17, %v1492_v45 }
  0xab   :  { %s1331_s16 = sld [smem:[#allocation2 + $0xd]]  ;;  %v575_v52 = vadd.f32 %v573_v10, %v529_v54  ;;  %v349_v0 = vadd.f32 %v347_v24, %v302_v62  ;;  %v707_v54 = vmul.f32 %v706_v31, %v1536_v63  ;;  %v753_v10 = vmul.f32 %v752_v32, %v1542_v22 }
  0xac   :  { %2372 = sst [smem:[#allocation74_spill]] %s1318_s9  ;;  %v441_v62 = vmul.f32 %v2270_v38, %v1441_v61  ;;  %v487_v50 = vmul.f32 %v486_v39, %v1447_v19  ;;  %v255_v11 = vadd.f32 %v253_v16, %v208_v36  ;;  %v295_v17 = vmul.f32 %v293_v20, %v1383_v5  ;;  %s1051_s9 = smov 3  }
  0xad   :  { %2374 = sst [smem:[#allocation75_spill]] %s1324_s22  ;;  %v617_v3 = vadd.f32 %v615_v29, %v575_v52  ;;  %v396_v24 = vadd.f32 %v394_v15, %v349_v0  ;;  %v533_v29 = vmul.f32 %v2272_v40, %v1478_v8  ;;  %v579_v37 = vmul.f32 %v2271_v41, %v1498_v33 }
  0xae   :  { %s1338_s21 = sld [smem:[#allocation2 + $0x14]]  ;;  %v476_v38 = vrot.slane %v1452_v60, 5  ;;  %v297_v15 = vadd.f32 %v295_v17, %v255_v11  ;;  %v342_v36 = vmul.f32 %v340_v21, %v1505_v55  ;;  %v522_v20 = vrot.slane %v1452_v60, 6 }
  0xaf   :  { %s1345_s13 = sld [smem:[#allocation2 + $0x1b]]  ;;  %v663_v52 = vadd.f32 %v661_v58, %v617_v3  ;;  %v443_v0 = vadd.f32 %v441_v62, %v396_v24  ;;  %v621_v58 = vmul.f32 %v620_v42, %v1408_v57  ;;  %v667_v3 = vmul.f32 %v666_v43, %v1524_v49 }
  0xb0   :  { %s1353_s4 = sld [smem:[#allocation2 + $0x22]]  ;;  %v568_v41 = vrot.slane %v1452_v60, 7  ;;  %v713_v62 = vmul.f32 %v712_v44, %v1536_v63  ;;  %v344_v24 = vadd.f32 %v342_v36, %v297_v15  ;;  %v389_v21 = vmul.f32 %v387_v23, %v1518_v59 }
  0xb1   :  { %2375 = sst [smem:[#allocation76_spill]] %s1331_s16  ;;  %v709_v16 = vadd.f32 %v707_v54, %v663_v52  ;;  %v489_v40 = vadd.f32 %v487_v50, %v443_v0  ;;  %v1612_v54 = vsel %vm153_vm4, %v475_v56, %v476_v38  ;;  %v170_v50 = vmul.f32 %v169_v46, %v1373_v12 }
  0xb2   :  { %s1366_s23 = sld [smem:[#allocation2 + $0x29]]  ;;  %v217_v17 = vmul.f32 %v216_v47, %v1377_v18  ;;  %v391_v0 = vadd.f32 %v389_v21, %v344_v24  ;;  %v2417_v15 = vrot.slane %v1408_v57, 6 }
  0xb3   :  { %s1380_s3 = sld [smem:[#allocation2 + $0x30]]  ;;  %v755_v11 = vadd.f32 %v753_v10, %v709_v16  ;;  %v535_v52 = vadd.f32 %v533_v29, %v489_v40  ;;  %v1637_v40 = vsel %vm247_vm6, %v567_v51, %v568_v41  ;;  %v1655_v41 = vsel %vm336_vm7, %v656_v9, 0.0 }
  0xb4   :  { %2377 = sst [smem:[#allocation77_spill]] %s1338_s21  ;;  %v1627_v38 = vsel %vm200_vm5, %v2417_v15, %v522_v20  ;;  %v219_v29 = vadd.f32 %v217_v17, %v170_v50  ;;  %v616_v15 = vmul.f32 %v614_v28, %v1452_v60  ;;  %v574_v28 = vmul.f32 %v572_v27, %v1637_v40 }
  0xb5   :  { %2379 = sst [smem:[#allocation78_spill]] %s1345_s13  ;;  %793 = vrot.lane.b32.xlu0 %v755_v11, %s1051_s9  ;;  %v581_v24 = vadd.f32 %v579_v37, %v535_v52  ;;  %v1670_v9 = vsel %vm383_vm8, %v702_v25, 0.0  ;;  %v1685_v25 = vsel %vm430_vm9, %v748_v48, 0.0 }
  0xb6   :  { %2380 = sst [smem:[#allocation79_spill]] %s1353_s4 }
  0xb7   :  { %s1392_s6 = sld [smem:[#allocation2 + $0x37]]  ;;  %v623_v17 = vadd.f32 %v621_v58, %v581_v24 }
  0xb8   :  { %2383 = sst [smem:[#allocation11_spill]] %s1366_s23  ;;  %s2274_s23 = smov 2  }
  0xb9   :  { %2385 = sst [smem:[#allocation12_spill]] %s1380_s3  ;;  %v669_v27 = vadd.f32 %v667_v3, %v623_v17  ;;  %v259_v3 = vmul.f32 %v257_v34, %v1492_v45  ;;  %v301_v34 = vmul.f32 %v299_v35, %v1383_v5 }
  0xba   :  { %s2390_s4 = sld [smem:[#allocation17_spill]] }
  0xbb   :  { %s2391_s13 = sld [smem:[#allocation20_spill]] }
  0xbc   :  { %s2392_s25 = sld [smem:[#allocation19_spill]] }
  0xbd   :  { %2386 = sst [smem:[#allocation13_spill]] %s1392_s6 }
  0xbe   :  { %s2393_s16 = sld [smem:[#allocation26_spill]] }
  0xbf   :  { %s2398_s26 = sld [smem:[#allocation29_spill]] }
  0xc0   :  { %s2401_s1 = sld [smem:[#allocation30_spill]]  ;;  %v2415_v23 = vstv %s2390_s4 }
  0xc1   :  { %s2406_s27 = sld [smem:[#allocation33_spill]]  ;;  %v436_v10 = vmul.f32 %v2415_v23, %v1555_v7  ;;  %v2420_v11 = vstv %s2391_s13 }
  0xc2   :  { %s2413_s30 = sld [smem:[#allocation38_spill]]  ;;  %v482_v23 = vmul.f32 %v2420_v11, %v1612_v54 }
  0xc3   :  { %s2414_s18 = sld [smem:[#allocation41_spill]]  ;;  %v438_v21 = vadd.f32 %v436_v10, %v391_v0  ;;  %v2422_v0 = vstv %s2392_s25 }
  0xc4   :  { %s2416_s21 = sld [smem:[#allocation42_spill]] }
  0xc5   :  { %v484_v52 = vadd.f32 %v482_v23, %v438_v21  ;;  %s2423_s20 = sld [smem:[#allocation43_spill]]  ;;  %v662_v21 = vmul.f32 %v660_v30, %v1655_v41  ;;  %v2427_v23 = vstv %s1165_s12 }
  0xc6   :  { %s2425_s3 = sld [smem:[#allocation44_spill]] }
  0xc7   :  { %s2432_s22 = sld [smem:[#allocation47_spill]] }
  0xc8   :  { %v2418_v56 = vstv %s2413_s30  ;;  %s2433_s25 = sld [smem:[#allocation48_spill]] }
  0xc9   :  { %v759_v36 = vmul.f32 %v2418_v56, %v1542_v22  ;;  %v2419_v16 = vstv %s2414_s18  ;;  %v528_v56 = vmul.f32 %v526_v26, %v1627_v38  ;;  %v165_v26 = vmul.f32 %v2422_v0, %v1514_v6  ;;  %s2435_s4 = sld [smem:[#allocation31_spill]] }
  0xca   :  { %v264_v20 = vmul.f32 %v2419_v16, %v1403_v4  ;;  %v2421_v37 = vstv %s2416_s21  ;;  %v2426_v16 = vstv %s2393_s16  ;;  %s2430_s16 = sld [smem:[#allocation53_spill]] }
  0xcb   :  { %v306_v50 = vmul.f32 %v2421_v37, %v1348_v14  ;;  %v530_v24 = vadd.f32 %v528_v56, %v484_v52  ;;  %v715_v56 = vadd.f32 %v713_v62, %v669_v27  ;;  %v2428_v13 = vstv %s2423_s20  ;;  %s2437_s5 = sld [smem:[#allocation54_spill]] }
  0xcc   :  { %v266_v51 = vadd.f32 %v264_v20, %v219_v29  ;;  %v2424_v29 = vstv %s1163_s11  ;;  %v212_v20 = vmul.f32 %v2426_v16, %v1460_v53  ;;  %v447_v48 = vmul.f32 %v2428_v13, %v1441_v61  ;;  %s2442_s6 = sld [smem:[#allocation50_spill]] }
  0xcd   :  { %v353_v58 = vmul.f32 %v2424_v29, %v1417_v2  ;;  %v576_v30 = vadd.f32 %v574_v28, %v530_v24  ;;  %v2429_v52 = vstv %s2425_s3  ;;  %v2431_v28 = vstv %s2398_s26  ;;  %s2440_s26 = sld [smem:[#allocation49_spill]] }
  0xce   :  { %v308_v10 = vadd.f32 %v306_v50, %v266_v51  ;;  %v400_v51 = vmul.f32 %v2427_v23, %v1430_v1  ;;  %v214_v37 = vadd.f32 %v212_v20, %v165_v26  ;;  %v708_v50 = vmul.f32 %v706_v31, %v1670_v9  ;;  %s2444_s10 = sld [smem:[#allocation55_spill]] }
  0xcf   :  { %v493_v0 = vmul.f32 %v2429_v52, %v1447_v19  ;;  %v618_v62 = vadd.f32 %v616_v15, %v576_v30  ;;  %v754_v31 = vmul.f32 %v752_v32, %v1685_v25  ;;  %v348_v29 = vmul.f32 %v2431_v28, %v1505_v55  ;;  %s2451_s13 = sld [smem:[#allocation56_spill]] }
  0xd0   :  { %v355_v11 = vadd.f32 %v353_v58, %v308_v10  ;;  %v261_v26 = vadd.f32 %v259_v3, %v214_v37  ;;  %v761_v10 = vadd.f32 %v759_v36, %v715_v56  ;;  %v2434_v20 = vstv %s2356_s15  ;;  %s2453_s17 = sld [smem:[#allocation57_spill]] }
  0xd1   :  { %v182_v27 = vmul.f32 %v2434_v20, %v1373_v12  ;;  %v2436_v24 = vstv %s2358_s14  ;;  %v664_v36 = vadd.f32 %v662_v21, %v618_v62  ;;  %v2438_v32 = vstv %s2349_s7  ;;  %s2461_s2 = sld [smem:[#allocation65_spill]] }
  0xd2   :  { %v402_v17 = vadd.f32 %v400_v51, %v355_v11  ;;  %v303_v16 = vadd.f32 %v301_v34, %v261_v26  ;;  %v229_v35 = vmul.f32 %v2436_v24, %v1377_v18  ;;  %799 = vrot.lane.b32.xlu0 %v761_v10, %s2274_s23  ;;  %v539_v15 = vmul.f32 %v2438_v32, %v1478_v8  ;;  %s2464_s29 = sld [smem:[#allocation59_spill]] }
  0xd3   :  { %v2439_v11 = vstv %s2350_s8  ;;  %v2441_v51 = vstv %s2401_s1  ;;  %v2443_v13 = vstv %s2430_s16  ;;  %v710_v21 = vadd.f32 %v708_v50, %v664_v36  ;;  %s2448_s1 = sld [smem:[#allocation34_spill]] }
  0xd4   :  { %v449_v58 = vadd.f32 %v447_v48, %v402_v17  ;;  %v585_v23 = vmul.f32 %v2439_v11, %v1498_v33  ;;  %v395_v37 = vmul.f32 %v2441_v51, %v1518_v59  ;;  %v350_v56 = vadd.f32 %v348_v29, %v303_v16  ;;  %s2469_s19 = sld [smem:[#allocation60_spill]] }
  0xd5   :  { %v231_v30 = vadd.f32 %v229_v35, %v182_v27  ;;  %v276_v48 = vmul.f32 %v2443_v13, %v1403_v4  ;;  %v2445_v17 = vstv %s2432_s22  ;;  %v2446_v26 = vstv %s2433_s25  ;;  %s2471_s28 = sld [smem:[#allocation61_spill]] }
  0xd6   :  { %v495_v3 = vadd.f32 %v493_v0, %v449_v58  ;;  %v627_v52 = vmul.f32 %v2445_v17, %v1408_v57  ;;  %v673_v34 = vmul.f32 %v2446_v26, %v1524_v49  ;;  %v2447_v10 = vstv %s2435_s4  ;;  %s2456_s4 = sld [smem:[#allocation58_spill]] }
  0xd7   :  { %v442_v62 = vmul.f32 %v2447_v10, %v1555_v7  ;;  %v397_v28 = vadd.f32 %v395_v37, %v350_v56  ;;  %v278_v29 = vadd.f32 %v276_v48, %v231_v30  ;;  %v2449_v58 = vstv %s2437_s5  ;;  %s2474_s24 = sld [smem:[#allocation68_spill]] }
  0xd8   :  { %v541_v0 = vadd.f32 %v539_v15, %v495_v3  ;;  %v318_v16 = vmul.f32 %v2449_v58, %v1348_v14  ;;  %v756_v50 = vadd.f32 %v754_v31, %v710_v21  ;;  %v2450_v20 = vstv %s2440_s26  ;;  %s2478_s0 = sld [smem:[#allocation63_spill]] }
  0xd9   :  { %v719_v27 = vmul.f32 %v2450_v20, %v1536_v63  ;;  %v2452_v24 = vstv %s2442_s6  ;;  %v488_v36 = vmul.f32 %v486_v39, %v1612_v54  ;;  %v444_v15 = vadd.f32 %v442_v62, %v397_v28  ;;  %s1845_s23 = sld [smem:[#allocation2 + $0x45]] }
  0xda   :  { %v765_v35 = vmul.f32 %v2452_v24, %v1542_v22  ;;  %v587_v32 = vadd.f32 %v585_v23, %v541_v0  ;;  %v320_v11 = vadd.f32 %v318_v16, %v278_v29  ;;  %v2454_v51 = vstv %s2444_s10  ;;  %795 = vrot.lane.b32.xlu1 %v756_v50, %s1051_s9  ;;  %s2484_s9 = sld [smem:[#allocation70_spill]] }
  0xdb   :  { %v365_v37 = vmul.f32 %v2454_v51, %v1417_v2  ;;  %v2455_v31 = vstv %s2406_s27  ;;  %v2457_v56 = vstv %s2448_s1  ;;  %v171_v39 = vmul.f32 %v169_v46, %v1514_v6  ;;  %s2462_s27 = sld [smem:[#allocation66_spill]] }
  0xdc   :  { %v534_v3 = vmul.f32 %v2455_v31, %v1627_v38  ;;  %v580_v30 = vmul.f32 %v2457_v56, %v1637_v40  ;;  %v218_v23 = vmul.f32 %v216_v47, %v1460_v53  ;;  %v629_v13 = vadd.f32 %v627_v52, %v587_v32  ;;  %s2489_s1 = sld [smem:[#allocation72_spill]] }
  0xdd   :  { %v490_v48 = vadd.f32 %v488_v36, %v444_v15  ;;  %v367_v21 = vadd.f32 %v365_v37, %v320_v11  ;;  %v2458_v17 = vstv %s2451_s13  ;;  %v622_v10 = vmul.f32 %v620_v42, %v1452_v60 }
  0xde   :  { %v412_v26 = vmul.f32 %v2458_v17, %v1430_v1  ;;  %v2459_v62 = vstv %s2453_s17  ;;  %v220_v28 = vadd.f32 %v218_v23, %v171_v39  ;;  %v2460_v46 = vstv %s2414_s18  ;;  %s2466_s18 = sld [smem:[#allocation67_spill]] }
  0xdf   :  { %v459_v0 = vmul.f32 %v2459_v62, %v1441_v61  ;;  %v265_v47 = vmul.f32 %v2460_v46, %v1492_v45  ;;  %v675_v52 = vadd.f32 %v673_v34, %v629_v13  ;;  %v536_v29 = vadd.f32 %v534_v3, %v490_v48 }
  0xe0   :  { %v414_v58 = vadd.f32 %v412_v26, %v367_v21  ;;  %v2463_v16 = vstv %s2456_s4  ;;  %v668_v42 = vmul.f32 %v666_v43, %v1655_v41  ;;  %v714_v20 = vmul.f32 %v712_v44, %v1670_v9 }
  0xe1   :  { %v505_v50 = vmul.f32 %v2463_v16, %v1447_v19  ;;  %v267_v24 = vadd.f32 %v265_v47, %v220_v28  ;;  %v2465_v36 = vstv %s2416_s21  ;;  %v721_v15 = vadd.f32 %v719_v27, %v675_v52  ;;  %s2479_s21 = sld [smem:[#allocation69_spill]] }
  0xe2   :  { %v307_v32 = vmul.f32 %v2465_v36, %v1383_v5  ;;  %v582_v34 = vadd.f32 %v580_v30, %v536_v29  ;;  %v2467_v11 = vstv %s2413_s30  ;;  %v461_v37 = vadd.f32 %v459_v0, %v414_v58  ;;  %s2273_s30 = smov 1  }
  0xe3   :  { %v760_v51 = vmul.f32 %v2467_v11, %v1685_v25  ;;  %v2468_v3 = vstv %s1163_s11  ;;  %v2470_v56 = vstv %s2461_s2  ;;  %v2472_v39 = vstv %s2462_s27  ;;  %s2476_s11 = sld [smem:[#allocation62_spill]] }
  0xe4   :  { %v309_v31 = vadd.f32 %v307_v32, %v267_v24  ;;  %v354_v43 = vmul.f32 %v2468_v3, %v1505_v55  ;;  %v188_v44 = vmul.f32 %v2470_v56, %v1373_v12  ;;  %v235_v23 = vmul.f32 %v2472_v39, %v1377_v18 }
  0xe5   :  { %v767_v13 = vadd.f32 %v765_v35, %v721_v15  ;;  %v624_v27 = vadd.f32 %v622_v10, %v582_v34  ;;  %v507_v30 = vadd.f32 %v505_v50, %v461_v37  ;;  %v2473_v48 = vstv %s2464_s29 }
  0xe6   :  { %v551_v21 = vmul.f32 %v2473_v48, %v1478_v8  ;;  %v356_v17 = vadd.f32 %v354_v43, %v309_v31  ;;  %v2475_v26 = vstv %s1165_s12  ;;  %v237_v0 = vadd.f32 %v235_v23, %v188_v44  ;;  %s1819_s12 = sld [smem:[#allocation2 + $0x3e]] }
  0xe7   :  { %v401_v62 = vmul.f32 %v2475_v26, %v1518_v59  ;;  %v2477_v28 = vstv %s2466_s18  ;;  %805 = vrot.lane.b32.xlu0 %v767_v13, %s2273_s30  ;;  %v670_v35 = vadd.f32 %v668_v42, %v624_v27  ;;  %v2480_v47 = vstv %s2469_s19  ;;  %s2493_s30 = sld [smem:[#allocation64_spill]] }
  0xe8   :  { %v282_v46 = vmul.f32 %v2477_v28, %v1403_v4  ;;  %v553_v10 = vadd.f32 %v551_v21, %v507_v30  ;;  %v597_v52 = vmul.f32 %v2480_v47, %v1498_v33  ;;  %v2481_v29 = vstv %s2471_s28 }
  0xe9   :  { %v639_v58 = vmul.f32 %v2481_v29, %v1408_v57  ;;  %v403_v16 = vadd.f32 %v401_v62, %v356_v17  ;;  %v2482_v50 = vstv %s2423_s20  ;;  %v2483_v32 = vstv %s2474_s24  ;;  %s2488_s20 = sld [smem:[#allocation71_spill]] }
  0xea   :  { %v448_v24 = vmul.f32 %v2482_v50, %v1555_v7  ;;  %v284_v36 = vadd.f32 %v282_v46, %v237_v0  ;;  %v324_v42 = vmul.f32 %v2483_v32, %v1348_v14  ;;  %v716_v15 = vadd.f32 %v714_v20, %v670_v35 }
  0xeb   :  { %v599_v34 = vadd.f32 %v597_v52, %v553_v10  ;;  %v2485_v11 = vstv %s2476_s11  ;;  %v2486_v31 = vstv %s2478_s0  ;;  %v2487_v56 = vstv %s2425_s3  ;;  %s2496_s3 = smov 2  }
  0xec   :  { %v685_v37 = vmul.f32 %v2485_v11, %v1524_v49  ;;  %v731_v3 = vmul.f32 %v2486_v31, %v1536_v63  ;;  %v450_v43 = vadd.f32 %v448_v24, %v403_v16  ;;  %v494_v44 = vmul.f32 %v2487_v56, %v1612_v54 }
  0xed   :  { %v326_v39 = vadd.f32 %v324_v42, %v284_v36  ;;  %v2490_v23 = vstv %s2479_s21  ;;  %v762_v20 = vadd.f32 %v760_v51, %v716_v15  ;;  %v641_v27 = vadd.f32 %v639_v58, %v599_v34 }
  0xee   :  { %v371_v13 = vmul.f32 %v2490_v23, %v1417_v2  ;;  %v2491_v30 = vstv %s2349_s7  ;;  %v2492_v21 = vstv %s2356_s15  ;;  %v496_v26 = vadd.f32 %v494_v44, %v450_v43  ;;  %s2500_s15 = sld [smem:[#allocation45_spill]] }
  0xef   :  { %v540_v48 = vmul.f32 %v2491_v30, %v1627_v38  ;;  %v183_v17 = vmul.f32 %v2492_v21, %v1514_v6  ;;  %v2494_v0 = vstv %s2484_s9  ;;  %v2495_v51 = vstv %s2358_s14  ;;  %801 = vrot.lane.b32.xlu1 %v762_v20, %s2496_s3  ;;  %s2502_s7 = sld [smem:[#allocation75_spill]] }
  0xf0   :  { %v373_v62 = vadd.f32 %v371_v13, %v326_v39  ;;  %v418_v28 = vmul.f32 %v2494_v0, %v1430_v1  ;;  %v230_v46 = vmul.f32 %v2495_v51, %v1460_v53  ;;  %v687_v35 = vadd.f32 %v685_v37, %v641_v27  ;;  %s2506_s14 = sld [smem:[#allocation76_spill]] }
  0xf1   :  { %v2497_v10 = vstv %s2350_s8  ;;  %v2498_v52 = vstv %s2488_s20  ;;  %v2499_v58 = vstv %s2489_s1  ;;  %v542_v50 = vadd.f32 %v540_v48, %v496_v26  ;;  %s2505_s8 = sld [smem:[#allocation46_spill]] }
  0xf2   :  { %v586_v47 = vmul.f32 %v2497_v10, %v1637_v40  ;;  %v465_v29 = vmul.f32 %v2498_v52, %v1441_v61  ;;  %v511_v16 = vmul.f32 %v2499_v58, %v1447_v19  ;;  %v420_v24 = vadd.f32 %v418_v28, %v373_v62  ;;  %s2519_s3 = sld [smem:[#allocation78_spill]] }
  0xf3   :  { %v232_v36 = vadd.f32 %v230_v46, %v183_v17  ;;  %v2501_v32 = vstv %s2430_s16  ;;  %v733_v15 = vadd.f32 %v731_v3, %v687_v35  ;;  %v2503_v34 = vstv %s2493_s30  ;;  %s2511_s16 = sld [smem:[#allocation51_spill]] }
  0xf4   :  { %v277_v42 = vmul.f32 %v2501_v32, %v1492_v45  ;;  %v777_v11 = vmul.f32 %v2503_v34, %v1542_v22  ;;  %v2504_v37 = vstv %s2432_s22  ;;  %v562_v43 = vstv %s1819_s12  ;;  %s2512_s22 = sld [smem:[#allocation77_spill]] }
  0xf5   :  { %v628_v31 = vmul.f32 %v2504_v37, %v1452_v60  ;;  %v588_v56 = vadd.f32 %v586_v47, %v542_v50  ;;  %v467_v44 = vadd.f32 %v465_v29, %v420_v24  ;;  %v2507_v23 = vstv %s2437_s5  ;;  %s2275_s5 = smov 127   ;;  %s2074_s12 = sld [smem:[#allocation2 + $0x26]] }
  0xf6   :  { %v279_v39 = vadd.f32 %v277_v42, %v232_v36  ;;  %v319_v13 = vmul.f32 %v2507_v23, %v1383_v5  ;;  %v779_v20 = vadd.f32 %v777_v11, %v733_v15  ;;  %v2508_v3 = vstv %s2433_s25  ;;  %s2517_s25 = sld [smem:[#allocation52_spill]] }
  0xf7   :  { %v674_v27 = vmul.f32 %v2508_v3, %v1655_v41  ;;  %v2509_v30 = vstv %s2500_s15  ;;  %v2510_v21 = vstv %s2444_s10  ;;  %v630_v26 = vadd.f32 %v628_v31, %v588_v56  ;;  %s2518_s10 = sld [smem:[#allocation73_spill]] }
  0xf8   :  { %v557_v48 = vmul.f32 %v2509_v30, %v1478_v8  ;;  %v366_v17 = vmul.f32 %v2510_v21, %v1505_v55  ;;  %v513_v62 = vadd.f32 %v511_v16, %v467_v44  ;;  %v321_v0 = vadd.f32 %v319_v13, %v279_v39  ;;  %813 = vrot.lane.b32.xlu0 %v779_v20, %s2275_s5  ;;  %s2530_s5 = sld [smem:[#allocation11_spill]] }
  0xf9   :  { %v2513_v28 = vstv %s2502_s7  ;;  %v2514_v46 = vstv %s2440_s26  ;;  %v2515_v10 = vstv %s2505_s8  ;;  %v2516_v52 = vstv %s2506_s14  ;;  %s2524_s26 = sld [smem:[#allocation79_spill]] }
  0xfa   :  { %v194_v51 = vmul.f32 %v2513_v28, %v1373_v12  ;;  %v720_v35 = vmul.f32 %v2514_v46, %v1670_v9  ;;  %v603_v47 = vmul.f32 %v2515_v10, %v1498_v33  ;;  %v241_v29 = vmul.f32 %v2516_v52, %v1377_v18 }
  0xfb   :  { %v608_v58 = vstv %s1845_s23  ;;  %v676_v16 = vadd.f32 %v674_v27, %v630_v26  ;;  %v559_v50 = vadd.f32 %v557_v48, %v513_v62  ;;  %v368_v24 = vadd.f32 %v366_v17, %v321_v0  ;;  %s876_s23 = sld [smem:[#allocation2 + $0x3]] }
  0xfc   :  { %v2520_v36 = vstv %s2451_s13  ;;  %v2521_v42 = vstv %s2442_s6  ;;  %v2522_v34 = vstv %s2511_s16  ;;  %v243_v37 = vadd.f32 %v241_v29, %v194_v51  ;;  %s1914_s13 = sld [smem:[#allocation2 + $0x4c]]  ;;  %s2537_s16 = smov 1  }
  0xfd   :  { %v413_v32 = vmul.f32 %v2520_v36, %v1518_v59  ;;  %v766_v15 = vmul.f32 %v2521_v42, %v1685_v25  ;;  %v645_v11 = vmul.f32 %v2522_v34, %v1408_v57  ;;  %v2523_v31 = vstv %s2512_s22  ;;  %s2527_s6 = sld [smem:[#allocation74_spill]] }
  0xfe   :  { %v288_v56 = vmul.f32 %v2523_v31, %v1403_v4  ;;  %v722_v44 = vadd.f32 %v720_v35, %v676_v16  ;;  %v605_v39 = vadd.f32 %v603_v47, %v559_v50  ;;  %v2525_v13 = vstv %s2453_s17  ;;  %s1928_s17 = sld [smem:[#allocation2 + $0x53]] }
  0xff   :  { %v415_v23 = vadd.f32 %v413_v32, %v368_v24  ;;  %v460_v20 = vmul.f32 %v2525_v13, %v1555_v7  ;;  %v2526_v3 = vstv %s2517_s25  ;;  %v2528_v30 = vstv %s2518_s10  ;;  %s2533_s10 = sld [smem:[#allocation12_spill]] }
 0x100   :  { %v691_v27 = vmul.f32 %v2526_v3, %v1524_v49  ;;  %v737_v48 = vmul.f32 %v2528_v30, %v1536_v63  ;;  %v290_v21 = vadd.f32 %v288_v56, %v243_v37  ;;  %v2529_v17 = vstv %s2519_s3  ;;  %s2536_s25 = sld [smem:[#allocation13_spill]] }
 0x101   :  { %v330_v26 = vmul.f32 %v2529_v17, %v1348_v14  ;;  %v768_v62 = vadd.f32 %v766_v15, %v722_v44  ;;  %v647_v0 = vadd.f32 %v645_v11, %v605_v39  ;;  %v462_v28 = vadd.f32 %v460_v20, %v415_v23 }
 0x102   :  { %v2531_v51 = vstv %s2456_s4  ;;  %v2532_v10 = vstv %s2524_s26  ;;  %v2534_v52 = vstv %s2461_s2  ;;  %v2535_v16 = vstv %s2462_s27  ;;  %s1968_s4 = sld [smem:[#allocation2 + $0x5a]]  ;;  %s1055_s2 = smov 126  }
 0x103   :  { %v506_v46 = vmul.f32 %v2531_v51, %v1612_v54  ;;  %v332_v35 = vadd.f32 %v330_v26, %v290_v21  ;;  %v377_v47 = vmul.f32 %v2532_v10, %v1417_v2  ;;  %v189_v29 = vmul.f32 %v2534_v52, %v1514_v6  ;;  %807 = vrot.lane.b32.xlu1 %v768_v62, %s2537_s16  ;;  %s1981_s27 = sld [smem:[#allocation2 + $0x61]] }
 0x104   :  { %v236_v50 = vmul.f32 %v2535_v16, %v1460_v53  ;;  %v693_v24 = vadd.f32 %v691_v27, %v647_v0  ;;  %v2538_v36 = vstv %s2527_s6  ;;  %v2539_v15 = vstv %s2464_s29  ;;  %s2559_s29 = sld [smem:[#allocation51_spill]] }
 0x105   :  { %v783_v32 = vmul.f32 %v2538_v36, %v1542_v22  ;;  %v508_v42 = vadd.f32 %v506_v46, %v462_v28  ;;  %v552_v34 = vmul.f32 %v2539_v15, %v1627_v38  ;;  %v379_v11 = vadd.f32 %v377_v47, %v332_v35  ;;  %s2113_s16 = sld [smem:[#allocation2 + $0x5e]] }
 0x106   :  { %v2540_v37 = vstv %s2530_s5  ;;  %v238_v56 = vadd.f32 %v236_v50, %v189_v29  ;;  %v2541_v44 = vstv %s2466_s18  ;;  %v739_v23 = vadd.f32 %v737_v48, %v693_v24  ;;  %s2561_s18 = smov 127  }
 0x107   :  { %v424_v31 = vmul.f32 %v2540_v37, %v1430_v1  ;;  %v283_v39 = vmul.f32 %v2541_v44, %v1492_v45  ;;  %v554_v13 = vadd.f32 %v552_v34, %v508_v42  ;;  %v2542_v20 = vstv %s2469_s19  ;;  %s2563_s19 = sld [smem:[#allocation52_spill]] }
 0x108   :  { %v598_v3 = vmul.f32 %v2542_v20, %v1637_v40  ;;  %v2543_v27 = vstv %s2533_s10  ;;  %v2544_v17 = vstv %s2536_s25  ;;  %v2545_v0 = vstv %s2474_s24  ;;  %s1056_s24 = smov 125  }
 0x109   :  { %v471_v30 = vmul.f32 %v2543_v27, %v1441_v61  ;;  %v426_v21 = vadd.f32 %v424_v31, %v379_v11  ;;  %v517_v26 = vmul.f32 %v2544_v17, %v1447_v19  ;;  %v285_v62 = vadd.f32 %v283_v39, %v238_v56 }
 0x10a   :  { %v325_v28 = vmul.f32 %v2545_v0, %v1383_v5  ;;  %v785_v48 = vadd.f32 %v783_v32, %v739_v23  ;;  %v600_v51 = vadd.f32 %v598_v3, %v554_v13  ;;  %v2546_v46 = vstv %s2471_s28  ;;  %s2566_s28 = sld [smem:[#allocation73_spill]] }
 0x10b   :  { %v640_v35 = vmul.f32 %v2546_v46, %v1452_v60  ;;  %v650_v10 = vstv %s1914_s13  ;;  %v473_v47 = vadd.f32 %v471_v30, %v426_v21  ;;  %v2547_v29 = vstv %s2479_s21  ;;  %s2071_s21 = sld [smem:[#allocation2 + $0x1f]] }
 0x10c   :  { %v327_v52 = vadd.f32 %v325_v28, %v285_v62  ;;  %v372_v16 = vmul.f32 %v2547_v29, %v1505_v55  ;;  %v2548_v50 = vstv %s2502_s7  ;;  %819 = vrot.lane.b32.xlu0 %v785_v48, %s1055_s2  ;;  %v2549_v32 = vstv %s2476_s11  ;;  %s883_s11 = sld [smem:[#allocation2 + $0xa]] }
 0x10d   :  { %v195_v24 = vmul.f32 %v2548_v50, %v1514_v6  ;;  %v642_v36 = vadd.f32 %v640_v35, %v600_v51  ;;  %v686_v42 = vmul.f32 %v2549_v32, %v1655_v41  ;;  %v696_v15 = vstv %s1928_s17  ;;  %s2098_s7 = sld [smem:[#allocation2 + $0x49]] }
 0x10e   :  { %v2550_v34 = vstv %s2506_s14  ;;  %v519_v37 = vadd.f32 %v517_v26, %v473_v47  ;;  %v563_v31 = vmul.f32 %v562_v43, %v1478_v8  ;;  %v374_v56 = vadd.f32 %v372_v16, %v327_v52  ;;  %s2108_s14 = sld [smem:[#allocation2 + $0x57]] }
 0x10f   :  { %v242_v11 = vmul.f32 %v2550_v34, %v1460_v53  ;;  %v2551_v44 = vstv %s2484_s9  ;;  %v688_v23 = vadd.f32 %v686_v42, %v642_v36  ;;  %v2552_v13 = vstv %s2478_s0  ;;  %s890_s0 = sld [smem:[#allocation2 + $0x11]] }
 0x110   :  { %v419_v39 = vmul.f32 %v2551_v44, %v1518_v59  ;;  %v732_v20 = vmul.f32 %v2552_v13, %v1670_v9  ;;  %v2553_v27 = vstv %s2512_s22  ;;  %v565_v21 = vadd.f32 %v563_v31, %v519_v37  ;;  %s2078_s9 = sld [smem:[#allocation2 + $0x2d]]  ;;  %s1057_s22 = smov 106  }
 0x111   :  { %v244_v3 = vadd.f32 %v242_v11, %v195_v24  ;;  %v289_v30 = vmul.f32 %v2553_v27, %v1492_v45  ;;  %v609_v17 = vmul.f32 %v608_v58, %v1498_v33  ;;  %v2554_v62 = vstv %s2488_s20  ;;  %s2080_s20 = sld [smem:[#allocation2 + $0x34]] }
 0x112   :  { %v421_v26 = vadd.f32 %v419_v39, %v374_v56  ;;  %v466_v0 = vmul.f32 %v2554_v62, %v1555_v7  ;;  %v734_v28 = vadd.f32 %v732_v20, %v688_v23  ;;  %v2555_v48 = vstv %s2493_s30  ;;  %s897_s30 = sld [smem:[#allocation2 + $0x18]] }
 0x113   :  { %v778_v51 = vmul.f32 %v2555_v48, %v1685_v25  ;;  %v291_v46 = vadd.f32 %v289_v30, %v244_v3  ;;  %v2556_v35 = vstv %s2519_s3  ;;  %v611_v52 = vadd.f32 %v609_v17, %v565_v21 }
 0x114   :  { %v331_v47 = vmul.f32 %v2556_v35, %v1383_v5  ;;  %v651_v29 = vmul.f32 %v650_v10, %v1408_v57  ;;  %v468_v16 = vadd.f32 %v466_v0, %v421_v26  ;;  %v2557_v50 = vstv %s2489_s1  ;;  %s2088_s1 = sld [smem:[#allocation2 + $0x3b]] }
 0x115   :  { %v512_v24 = vmul.f32 %v2557_v50, %v1612_v54  ;;  %v780_v36 = vadd.f32 %v778_v51, %v734_v28  ;;  %v742_v32 = vstv %s1968_s4  ;;  %v2558_v34 = vstv %s2524_s26 }
 0x116   :  { %v333_v42 = vadd.f32 %v331_v47, %v291_v46  ;;  %v378_v11 = vmul.f32 %v2558_v34, %v1505_v55  ;;  %v653_v37 = vadd.f32 %v651_v29, %v611_v52  ;;  %v697_v31 = vmul.f32 %v696_v15, %v1524_v49 }
 0x117   :  { %v514_v56 = vadd.f32 %v512_v24, %v468_v16  ;;  %v2560_v44 = vstv %s2500_s15  ;;  %815 = vrot.lane.b32.xlu1 %v780_v36, %s2561_s18  ;;  %v788_v23 = vstv %s1981_s27  ;;  %v2562_v20 = vstv %s2530_s5  ;;  %s2093_s15 = sld [smem:[#allocation2 + $0x42]]  ;;  %s1058_s5 = smov [#allocation7]  }
 0x118   :  { %v558_v39 = vmul.f32 %v2560_v44, %v1627_v38  ;;  %v380_v13 = vadd.f32 %v378_v11, %v333_v42  ;;  %v425_v3 = vmul.f32 %v2562_v20, %v1518_v59  ;;  %v699_v27 = vadd.f32 %v697_v31, %v653_v37 }
 0x119   :  { %v743_v30 = vmul.f32 %v742_v32, %v1536_v63  ;;  %v2564_v17 = vstv %s2505_s8  ;;  %v2565_v0 = vstv %s2533_s10  ;;  %v789_v51 = vmul.f32 %v788_v23, %v1542_v22  ;;  %s2103_s8 = sld [smem:[#allocation2 + $0x50]] }
 0x11a   :  { %v560_v21 = vadd.f32 %v558_v39, %v514_v56  ;;  %v604_v26 = vmul.f32 %v2564_v17, %v1637_v40  ;;  %v427_v62 = vadd.f32 %v425_v3, %v380_v13  ;;  %v472_v28 = vmul.f32 %v2565_v0, %v1555_v7 }
 0x11b   :  { %v745_v48 = vadd.f32 %v743_v30, %v699_v27  ;;  %v2567_v35 = vstv %s2559_s29  ;;  %v2568_v29 = vstv %s2536_s25  ;;  %v2569_v36 = vstv %s2563_s19  ;;  %s861_s25 = sshll.u32 %s1058_s5, 4  ;;  %s862_s25 = int_to_ptr.vmem [resolvable:$true] %s861_s25 }
 0x11c   :  { %v606_v46 = vadd.f32 %v604_v26, %v560_v21  ;;  %v646_v47 = vmul.f32 %v2567_v35, %v1452_v60  ;;  %v474_v52 = vadd.f32 %v472_v28, %v427_v62  ;;  %v518_v16 = vmul.f32 %v2568_v29, %v1612_v54  ;;  %s1020_s10 = scalar_lea.vmem %s862_s25, 512  ;;  %p1025_p6 = scmp.lt.s32.totalorder %s862_s25, %s862_s25 }
 0x11d   :  { %v791_v50 = vadd.f32 %v789_v51, %v745_v48  ;;  %v692_v42 = vmul.f32 %v2569_v36, %v1655_v41  ;;  %v564_v11 = vmul.f32 %v562_v43, %v1627_v38  ;;  %v2570_v31 = vstv %s2566_s28  ;;  %p1021_p5 = scmp.ne.s32.totalorder %s862_s25, %s1020_s10  ;;  %p1026_p7 = scmp.lt.s32.totalorder %s1020_s10, %s1020_s10 }
 0x11e   :  { %v648_v24 = vadd.f32 %v646_v47, %v606_v46  ;;  %v520_v34 = vadd.f32 %v518_v16, %v474_v52  ;;  %v738_v56 = vmul.f32 %v2570_v31, %v1670_v9  ;;  %v610_v39 = vmul.f32 %v608_v58, %v1637_v40 }
 0x11f   :  { %825 = vrot.lane.b32.xlu0 %v791_v50, %s1056_s24  ;;  %v2571_v20 = vstv %s2527_s6  ;;  %v652_v30 = vmul.f32 %v650_v10, %v1452_v60  ;;  %v698_v17 = vmul.f32 %v696_v15, %v1655_v41  ;;  %v744_v62 = vmul.f32 %v742_v32, %v1670_v9  ;;  %p1027_p8 = por %p1026_p7, %p1025_p6 }
 0x120   :  { %v694_v37 = vadd.f32 %v692_v42, %v648_v24  ;;  %v566_v44 = vadd.f32 %v564_v11, %v520_v34  ;;  %v784_v3 = vmul.f32 %v2571_v20, %v1685_v25  ;;  %v790_v58 = vmul.f32 %v788_v23, %v1685_v25 }
 0x121   :  { %v175_v48 = vstv %s876_s23  ;;  %v222_v10 = vstv %s883_s11  ;;  %v269_v46 = vstv %s890_s0  ;;  %v311_v23 = vstv %s897_s30  ;;  %p1028_p9 = pnand %p1027_p8, %p1021_p5 }
 0x122   :  { %v740_v13 = vadd.f32 %v738_v56, %v694_v37  ;;  %v612_v27 = vadd.f32 %v610_v39, %v566_v44  ;;  %v176_v51 = vmul.f32 %v175_v48, %v1373_v12  ;;  %v223_v15 = vmul.f32 %v222_v10, %v1377_v18 }
 0x123   :  { %v270_v35 = vmul.f32 %v269_v46, %v1403_v4  ;;  %v312_v52 = vmul.f32 %v311_v23, %v1348_v14  ;;  %v358_v29 = vstv %s2071_s21  ;;  %v177_v18 = vmul.f32 %v175_v48, %v1514_v6 }
 0x124   :  { %v786_v21 = vadd.f32 %v784_v3, %v740_v13  ;;  %v654_v43 = vadd.f32 %v652_v30, %v612_v27  ;;  %v225_v32 = vadd.f32 %v223_v15, %v176_v51  ;;  %v224_v16 = vmul.f32 %v222_v10, %v1460_v53 }
 0x125   :  { %v359_v4 = vmul.f32 %v358_v29, %v1417_v2  ;;  %v405_v50 = vstv %s2074_s12  ;;  %v452_v14 = vstv %s2078_s9  ;;  %v271_v34 = vmul.f32 %v269_v46, %v1492_v45 }
 0x126   :  { %821 = vrot.lane.b32.xlu1 %v786_v21, %s1055_s2  ;;  %v700_v26 = vadd.f32 %v698_v17, %v654_v43  ;;  %v272_v47 = vadd.f32 %v270_v35, %v225_v32  ;;  %v226_v36 = vadd.f32 %v224_v16, %v177_v18  ;;  %v406_v42 = vmul.f32 %v405_v50, %v1430_v1 }
 0x127   :  { %v498_v37 = vstv %s2080_s20  ;;  %v453_v6 = vmul.f32 %v452_v14, %v1441_v61  ;;  %v313_v53 = vmul.f32 %v311_v23, %v1383_v5  ;;  %v544_v44 = vstv %s2088_s1  ;;  %v794_v61 = vpop.permute.xlu0 %793 }
 0x128   :  { %v746_v0 = vadd.f32 %v744_v62, %v700_v26  ;;  %v314_v12 = vadd.f32 %v312_v52, %v272_v47  ;;  %v273_v31 = vadd.f32 %v271_v34, %v226_v36  ;;  %v499_v56 = vmul.f32 %v498_v37, %v1447_v19 }
 0x129   :  { %v360_v45 = vmul.f32 %v358_v29, %v1505_v55  ;;  %v545_v20 = vmul.f32 %v544_v44, %v1478_v8  ;;  %v590_v3 = vstv %s2093_s15  ;;  %v407_v5 = vmul.f32 %v405_v50, %v1518_v59 }
 0x12a   :  { %v792_v28 = vadd.f32 %v790_v58, %v746_v0  ;;  %v361_v24 = vadd.f32 %v359_v4, %v314_v12  ;;  %v315_v1 = vadd.f32 %v313_v53, %v273_v31  ;;  %v591_v30 = vmul.f32 %v590_v3, %v1498_v33 }
 0x12b   :  { %v632_v21 = vstv %s2098_s7  ;;  %v454_v55 = vmul.f32 %v452_v14, %v1555_v7  ;;  %v678_v62 = vstv %s2103_s8  ;;  %v500_v59 = vmul.f32 %v498_v37, %v1612_v54 }
 0x12c   :  { %827 = vrot.lane.b32.xlu1 %v792_v28, %s1056_s24  ;;  %v408_v11 = vadd.f32 %v406_v42, %v361_v24  ;;  %v362_v13 = vadd.f32 %v360_v45, %v315_v1  ;;  %v633_v26 = vmul.f32 %v632_v21, %v1408_v57  ;;  %v679_v33 = vmul.f32 %v678_v62, %v1524_v49 }
 0x12d   :  { %v724_v48 = vstv %s2108_s14  ;;  %v546_v10 = vmul.f32 %v544_v44, %v1627_v38  ;;  %v770_v57 = vstv %s2113_s16  ;;  %v592_v32 = vmul.f32 %v590_v3, %v1637_v40 }
 0x12e   :  { %v455_v2 = vadd.f32 %v453_v6, %v408_v11  ;;  %v409_v19 = vadd.f32 %v407_v5, %v362_v13  ;;  %v725_v46 = vmul.f32 %v724_v48, %v1536_v63  ;;  %v771_v49 = vmul.f32 %v770_v57, %v1542_v22 }
 0x12f   :  { %v634_v12 = vmul.f32 %v632_v21, %v1452_v60  ;;  %v680_v50 = vmul.f32 %v678_v62, %v1655_v41  ;;  %v726_v40 = vmul.f32 %v724_v48, %v1670_v9  ;;  %v772_v60 = vmul.f32 %v770_v57, %v1685_v25 }
 0x130   :  { %v501_v39 = vadd.f32 %v499_v56, %v455_v2  ;;  %v456_v8 = vadd.f32 %v454_v55, %v409_v19 }
 0x132   :  { %v547_v27 = vadd.f32 %v545_v20, %v501_v39  ;;  %v502_v58 = vadd.f32 %v500_v59, %v456_v8 }
 0x134   :  { %v593_v43 = vadd.f32 %v591_v30, %v547_v27  ;;  %v548_v15 = vadd.f32 %v546_v10, %v502_v58 }
 0x136   :  { %v635_v0 = vadd.f32 %v633_v26, %v593_v43  ;;  %v594_v54 = vadd.f32 %v592_v32, %v548_v15 }
 0x138   :  { %v681_v51 = vadd.f32 %v679_v33, %v635_v0  ;;  %v636_v38 = vadd.f32 %v634_v12, %v594_v54 }
 0x13a   :  { %v727_v23 = vadd.f32 %v725_v46, %v681_v51  ;;  %v682_v24 = vadd.f32 %v680_v50, %v636_v38 }
 0x13c   :  { %v773_v18 = vadd.f32 %v771_v49, %v727_v23  ;;  %v728_v34 = vadd.f32 %v726_v40, %v682_v24 }
 0x13e   :  { %v774_v53 = vadd.f32 %v772_v60, %v728_v34 }
 0x144   :  { %v800_v17 = vpop.permute.xlu0 %799 }
 0x145   :  { %v803_v35 = vadd.f32 %v800_v17, %v794_v61 }
 0x14c   :  { %v796_v7 = vpop.permute.xlu1 %795 }
 0x159   :  { %v806_v28 = vpop.permute.xlu0 %805 }
 0x15a   :  { %v809_v52 = vadd.f32 %v806_v28, %v803_v35 }
 0x15c   :  { %v811_v16 = vadd.f32 %v809_v52, %v773_v18 }
 0x161   :  { %v802_v29 = vpop.permute.xlu1 %801 }
 0x162   :  { %v804_v14 = vadd.f32 %v802_v29, %v796_v7 }
 0x16a   :  { %v814_v47 = vpop.permute.xlu0 %813 }
 0x16b   :  { %v817_v36 = vadd.f32 %v814_v47, %v811_v16 }
 0x175   :  { %v808_v63 = vpop.permute.xlu1 %807 }
 0x176   :  { %v810_v22 = vadd.f32 %v808_v63, %v804_v14 }
 0x178   :  { %v812_v56 = vadd.f32 %v810_v22, %v774_v53 }
 0x17e   :  { %v820_v4 = vpop.permute.xlu0 %819 }
 0x17f   :  { %v823_v42 = vadd.f32 %v820_v4, %v817_v36 }
 0x189   :  { %v816_v37 = vpop.permute.xlu1 %815 }
 0x18a   :  { %v818_v1 = vadd.f32 %v816_v37, %v812_v56 }
 0x191   :  { %v826_v11 = vpop.permute.xlu0 %825 }
 0x192   :  { %v829_v31 = vadd.f32 %v826_v11, %v823_v42 }
 0x194   :  { %v831_v6 = vsub.f32 0.0, %v829_v31 }
 0x196   :  { %v833_v2 = vmul.f32 1.442695, %v831_v6 }
 0x198   :  { %984 = vpow2.f32 %v833_v2  ;;  %v822_v41 = vpop.permute.xlu1 %821 }
 0x199   :  { %v824_v44 = vadd.f32 %v822_v41, %v818_v1 }
 0x19e   :  { %v828_v45 = vpop.permute.xlu1 %827 }
 0x19f   :  { %v830_v39 = vadd.f32 %v828_v45, %v824_v44 }
 0x1a1   :  { %v832_v9 = vsub.f32 0.0, %v830_v39 }
 0x1a3   :  { %v835_v13 = vmul.f32 1.442695, %v832_v9 }
 0x1a5   :  { %v985_v20 = vpop.eup %984  ;;  %986 = vpow2.f32 %v835_v13 }
 0x1a6   :  { %v837_v61 = vadd.f32 1.0, %v985_v20 }
 0x1a8   :  { %988 = vrcp.f32 %v837_v61 }
 0x1b2   :  { %v987_v3 = vpop.eup %986 }
 0x1b3   :  { %v838_v5 = vadd.f32 1.0, %v987_v3 }
 0x1b5   :  { %v989_v27 = vpop.eup %988  ;;  %990 = vrcp.f32 %v838_v5 }
 0x1b6   :  { %843 = vst.msk [vmem:[#allocation7] sm:$0xff] %vm53_vm0, %v989_v27  ;;  %847 = vrot.lane.b32.xlu0 %v989_v27, %s1057_s22 }
 0x1c2   :  { %v991_v25 = vpop.eup %990 }
 0x1c3   :  { %844 = vst.msk [vmem:[#allocation7 + $0x8] sm:$0xff] %vm53_vm0, %v991_v25  ;;  %849 = vrot.lane.b32.xlu1 %v991_v25, %s1057_s22 }
 0x228   :  { %v848_v19 = vpop.permute.xlu0 %847 }
 0x229   :  { %854 = vst.msk [vmem:[#allocation7 + $0x10] sm:$0xff] %vm53_vm0, %v848_v19 }
 0x235   :  { %v850_v30 = vpop.permute.xlu1 %849 }
 0x236   :  { %855 = vst.msk [vmem:[#allocation7 + $0x18] sm:$0xff] %vm53_vm0, %v850_v30 }
 0x237   :  { %1031 = shalt.err (!%p1028_p9)
}
 0x238   :  { %s2572_s3 = smov 8   ;;  %s2573_s26 = smov 128  }
 0x239   :  { %s2574_s17 = sld [smem:[#allocation80_spill]] }
 0x23f   :  { %867 = dma.vmem_to_hbm [thread:$0]  %s862_s25, 512, %s2574_s17, [#allocation4], %s2573_s26, %s2573_s26, %s2572_s3  }
 0x240   :  { %1044 = dma.done.wait [#allocation4], 512  }
 0x241   :  { %1045 = vsyncadd [#allocation4], 4294966784 }
 0x242   :  { %871 = vsyncpa [#allocation3], 1 }
 0x243   :  { %872 = vsyncpa [#allocation4], 1 }
 0x244   :  { %873 = vsyncpa [#allocation5], 1 }

</bundles_post_ra>
